<compile_context>
chip_gen: v5e
topology: v5e:2x2
jax: 0.10.0
libtpu: 0.0.40
codegen_flags: <defaults>
</compile_context>

<pallas_src>
import jax
import jax.numpy as jnp
from jax.experimental import pallas as pl
from jax.experimental.pallas import tpu as pltpu

IN_FEATURES = 28 * 28          # 784
H0, H1 = 512, 128
OUT_FEATURES = 10
OUT_PAD = 128                  # lane-dense output / N for the last matmul
NEG_BIG = -1e30                # kills padded logit columns inside log_softmax


def mlp_kernel(x_ref, w0_ref, b0_ref, w1_ref, b1_ref, w2_ref, b2_ref, o_ref):
    # layer 0: cast the f32 x tile to bf16 on the VPU (hidden under MXU/DMA),
    # (TB, 784) @ (784, 512) bf16 -> f32 accumulate, bias + ReLU
    x = x_ref[...].astype(jnp.bfloat16)
    h0 = jnp.dot(x, w0_ref[...], preferred_element_type=jnp.float32)
    h0 = jnp.maximum(h0 + b0_ref[...], 0.0)
    # layer 1: (TB, 512) @ (512, 128)
    h1 = jnp.dot(h0.astype(jnp.bfloat16), w1_ref[...],
                 preferred_element_type=jnp.float32)
    h1 = jnp.maximum(h1 + b1_ref[...], 0.0)
    # layer 2: (TB, 128) @ (128, 128); padded bias columns are -1e30
    logits = jnp.dot(h1.astype(jnp.bfloat16), w2_ref[...],
                     preferred_element_type=jnp.float32)
    logits = logits + b2_ref[...]
    # numerically stable log_softmax along the lane axis, in f32
    # (padded columns sit at ~-1e30 so exp underflows cleanly to 0)
    m = jnp.max(logits, axis=1, keepdims=True)
    lse = m + jnp.log(jnp.sum(jnp.exp(logits - m), axis=1, keepdims=True))
    o_ref[...] = (logits - lse).astype(o_ref.dtype)   # cast only after log_softmax


def _round_up(a, b):
    return (a + b - 1) // b * b


def _pick_tb(B):
    # Small batches: a single tile, rows just sublane-aligned (f32 -> 8).
    if B <= 1024:
        return _round_up(B, 8)
    # Large batches: biggest tile whose batch-padding waste stays under ~10%.
    for tb in (1024, 512, 256, 128):
        if (_round_up(B, tb) - B) * 10 <= B:
            return tb
    return 128


def pack_params(w0, b0, w1, b1, w2, b2):
    """One-time constant packing (call outside the per-step forward):
    bf16 weights, f32 biases, output layer padded 10 -> 128 lanes with a
    -1e30 bias on the padded logit columns."""
    w0_p = w0.astype(jnp.bfloat16)                                   # (784, 512)
    w1_p = w1.astype(jnp.bfloat16)                                   # (512, 128)
    w2_p = jnp.zeros((H1, OUT_PAD), jnp.bfloat16)
    w2_p = w2_p.at[:, :OUT_FEATURES].set(w2.astype(jnp.bfloat16))    # (128, 128)
    b0_p = b0.astype(jnp.float32).reshape(1, H0)
    b1_p = b1.astype(jnp.float32).reshape(1, H1)
    b2_p = jnp.full((1, OUT_PAD), NEG_BIG, jnp.float32)
    b2_p = b2_p.at[:, :OUT_FEATURES].set(
        b2.astype(jnp.float32).reshape(1, OUT_FEATURES))
    return w0_p, b0_p, w1_p, b1_p, w2_p, b2_p


@jax.jit
def mlp_forward(x_nchw, w0, b0, w1, b1, w2, b2):
    """x_nchw: (B, 1, 28, 28) f32; weights/biases pre-packed via pack_params."""
    B = x_nchw.shape[0]
    x = x_nchw.reshape(B, IN_FEATURES).astype(jnp.float32)   # torch.flatten(x, 1)

    TB = _pick_tb(B)
    B_pad = _round_up(B, TB)
    if B_pad != B:
        x = jnp.pad(x, ((0, B_pad - B), (0, 0)))
    grid = (B_pad // TB,)

    def const(shape):
        # full-array block, constant index_map -> DMA'd once, VMEM-resident
        return pl.BlockSpec(shape, lambda i: (0, 0))

    out_p = pl.pallas_call(
        mlp_kernel,
        out_shape=jax.ShapeDtypeStruct((B_pad, OUT_PAD), jnp.bfloat16),
        grid=grid,
        in_specs=[
            # x: f32, batch-tiled, full 784 last dim (== array dim, so legal)
            pl.BlockSpec((TB, IN_FEATURES), lambda i: (i, 0)),
            const((IN_FEATURES, H0)), const((1, H0)),         # w0, b0
            const((H0, H1)),          const((1, H1)),         # w1, b1
            const((H1, OUT_PAD)),     const((1, OUT_PAD)),    # w2, b2
        ],
        out_specs=pl.BlockSpec((TB, OUT_PAD), lambda i: (i, 0)),
        compiler_params=pltpu.CompilerParams(
            dimension_semantics=("parallel",),
            vmem_limit_bytes=48 * 1024 * 1024),
    )(x, w0, b0, w1, b1, w2, b2)

    return out_p[:B, :OUT_FEATURES]


def init_params(key):
    """Deterministic init mimicking nn.Linear's U(-1/sqrt(fan_in), 1/sqrt(fan_in))."""
    def linear(k, fan_in, fan_out):
        kw, kb = jax.random.split(k)
        bound = 1.0 / jnp.sqrt(fan_in)
        # stored as (in, out) so the kernel does x @ W
        w = jax.random.uniform(kw, (fan_in, fan_out), jnp.float32, -bound, bound)
        b = jax.random.uniform(kb, (1, fan_out), jnp.float32, -bound, bound)
        return w, b

    k0, k1, k2 = jax.random.split(key, 3)
    w0, b0 = linear(k0, IN_FEATURES, H0)
    w1, b1 = linear(k1, H0, H1)
    w2, b2 = linear(k2, H1, OUT_FEATURES)
    return w0, b0, w1, b1, w2, b2


def mlp_reference(x_nchw, w0, b0, w1, b1, w2, b2):
    x = x_nchw.reshape(x_nchw.shape[0], -1)
    h0 = jnp.maximum(x @ w0 + b0, 0.0)
    h1 = jnp.maximum(h0 @ w1 + b1, 0.0)
    logits = h1 @ w2 + b2
    return jax.nn.log_softmax(logits, axis=1)


if __name__ == "__main__":
    key = jax.random.PRNGKey(0)
    kx, kp = jax.random.split(key)

    # MNIST-like input, small batch
    x = jax.random.normal(kx, (2, 1, 28, 28), dtype=jnp.float32)
    params = init_params(kp)
    packed = pack_params(*params)          # one-time constant packing

    out = jax.block_until_ready(mlp_forward(x, *packed))

    ref = mlp_reference(x, *params)        # full-f32 reference
    assert out.shape == (2, 10)
    max_err = float(jnp.max(jnp.abs(out.astype(jnp.float32) - ref)))
    # bf16 matmul inputs / bf16 output with f32 accumulation -> loose tolerance
    assert jnp.allclose(out.astype(jnp.float32), ref, atol=5e-2), max_err
    # sanity: valid log-probabilities (rows sum to ~1 in prob space)
    assert jnp.allclose(jnp.sum(jnp.exp(out.astype(jnp.float32)), axis=1),
                        1.0, atol=2e-2)

    print("KERNEL_OK")
</pallas_src>

<mosaic_0001>
module attributes {stable_mosaic.version = 11 : i64} {
  func.func @mlp_kernel(%arg0: i32, %arg1: memref<8x784xf32, #tpu.memory_space<vmem>>, %arg2: memref<784x512xbf16, #tpu.memory_space<vmem>>, %arg3: memref<1x512xf32, #tpu.memory_space<vmem>>, %arg4: memref<512x128xbf16, #tpu.memory_space<vmem>>, %arg5: memref<1x128xf32, #tpu.memory_space<vmem>>, %arg6: memref<128x128xbf16, #tpu.memory_space<vmem>>, %arg7: memref<1x128xf32, #tpu.memory_space<vmem>>, %arg8: memref<8x128xbf16, #tpu.memory_space<vmem>>) attributes {dimension_semantics = [#tpu.dimension_semantics<parallel>], iteration_bounds = array<i64: 1>, scalar_prefetch = 0 : i64, scratch_operands = 0 : i64, tpu.core_type = #tpu.core_type<tc>, window_params = [{transform_indices = @transform_0, window_bounds = array<i64: 8, 784>}, {pipeline_mode = #tpu.pipeline_mode<synchronous>, transform_indices = @transform_1, window_bounds = array<i64: 784, 512>}, {pipeline_mode = #tpu.pipeline_mode<synchronous>, transform_indices = @transform_2, window_bounds = array<i64: 1, 512>}, {pipeline_mode = #tpu.pipeline_mode<synchronous>, transform_indices = @transform_3, window_bounds = array<i64: 512, 128>}, {pipeline_mode = #tpu.pipeline_mode<synchronous>, transform_indices = @transform_4, window_bounds = array<i64: 1, 128>}, {pipeline_mode = #tpu.pipeline_mode<synchronous>, transform_indices = @transform_5, window_bounds = array<i64: 128, 128>}, {pipeline_mode = #tpu.pipeline_mode<synchronous>, transform_indices = @transform_6, window_bounds = array<i64: 1, 128>}, {transform_indices = @transform_7, window_bounds = array<i64: 8, 128>}]} {
    %c0 = arith.constant 0 : index
    %c0_0 = arith.constant 0 : index
    %0 = vector.load %arg1[%c0, %c0_0] : memref<8x784xf32, #tpu.memory_space<vmem>>, vector<8x784xf32>
    %1 = arith.truncf %0 : vector<8x784xf32> to vector<8x784xbf16>
    %c0_1 = arith.constant 0 : index
    %c0_2 = arith.constant 0 : index
    %2 = vector.load %arg2[%c0_1, %c0_2] : memref<784x512xbf16, #tpu.memory_space<vmem>>, vector<784x512xbf16>
    %cst = arith.constant dense<0.000000e+00> : vector<8x512xf32>
    %3 = tpu.matmul %1, %2, %cst {dimension_numbers = #tpu.dot_dimension_numbers<[1], [0], [0], [1], [0, 0, 1, 1], [], []>} : vector<8x784xbf16>, vector<784x512xbf16>, vector<8x512xf32> -> vector<8x512xf32>
    %c0_3 = arith.constant 0 : index
    %c0_4 = arith.constant 0 : index
    %4 = vector.load %arg3[%c0_3, %c0_4] : memref<1x512xf32, #tpu.memory_space<vmem>>, vector<1x512xf32>
    %5 = vector.broadcast %4 : vector<1x512xf32> to vector<8x512xf32>
    %6 = arith.addf %3, %5 : vector<8x512xf32>
    %cst_5 = arith.constant 0.000000e+00 : f32
    %7 = vector.broadcast %cst_5 : f32 to vector<8x512xf32>
    %8 = arith.maximumf %6, %7 : vector<8x512xf32>
    %9 = arith.truncf %8 : vector<8x512xf32> to vector<8x512xbf16>
    %c0_6 = arith.constant 0 : index
    %c0_7 = arith.constant 0 : index
    %10 = vector.load %arg4[%c0_6, %c0_7] : memref<512x128xbf16, #tpu.memory_space<vmem>>, vector<512x128xbf16>
    %cst_8 = arith.constant dense<0.000000e+00> : vector<8x128xf32>
    %11 = tpu.matmul %9, %10, %cst_8 {dimension_numbers = #tpu.dot_dimension_numbers<[1], [0], [0], [1], [0, 0, 1, 1], [], []>} : vector<8x512xbf16>, vector<512x128xbf16>, vector<8x128xf32> -> vector<8x128xf32>
    %c0_9 = arith.constant 0 : index
    %c0_10 = arith.constant 0 : index
    %12 = vector.load %arg5[%c0_9, %c0_10] : memref<1x128xf32, #tpu.memory_space<vmem>>, vector<1x128xf32>
    %13 = vector.broadcast %12 : vector<1x128xf32> to vector<8x128xf32>
    %14 = arith.addf %11, %13 : vector<8x128xf32>
    %cst_11 = arith.constant 0.000000e+00 : f32
    %15 = vector.broadcast %cst_11 : f32 to vector<8x128xf32>
    %16 = arith.maximumf %14, %15 : vector<8x128xf32>
    %17 = arith.truncf %16 : vector<8x128xf32> to vector<8x128xbf16>
    %c0_12 = arith.constant 0 : index
    %c0_13 = arith.constant 0 : index
    %18 = vector.load %arg6[%c0_12, %c0_13] : memref<128x128xbf16, #tpu.memory_space<vmem>>, vector<128x128xbf16>
    %cst_14 = arith.constant dense<0.000000e+00> : vector<8x128xf32>
    %19 = tpu.matmul %17, %18, %cst_14 {dimension_numbers = #tpu.dot_dimension_numbers<[1], [0], [0], [1], [0, 0, 1, 1], [], []>} : vector<8x128xbf16>, vector<128x128xbf16>, vector<8x128xf32> -> vector<8x128xf32>
    %c0_15 = arith.constant 0 : index
    %c0_16 = arith.constant 0 : index
    %20 = vector.load %arg7[%c0_15, %c0_16] : memref<1x128xf32, #tpu.memory_space<vmem>>, vector<1x128xf32>
    %21 = vector.broadcast %20 : vector<1x128xf32> to vector<8x128xf32>
    %22 = arith.addf %19, %21 : vector<8x128xf32>
    %cst_17 = arith.constant dense<0xFF800000> : vector<8xf32>
    %23 = vector.multi_reduction <maximumf>, %22, %cst_17 [1] : vector<8x128xf32> to vector<8xf32>
    %24 = vector.shape_cast %23 : vector<8xf32> to vector<8x1xf32>
    %25 = vector.broadcast %24 : vector<8x1xf32> to vector<8x128xf32>
    %26 = arith.subf %22, %25 : vector<8x128xf32>
    %27 = math.exp %26 : vector<8x128xf32>
    %cst_18 = arith.constant dense<0.000000e+00> : vector<8xf32>
    %28 = vector.multi_reduction <add>, %27, %cst_18 [1] : vector<8x128xf32> to vector<8xf32>
    %29 = vector.shape_cast %28 : vector<8xf32> to vector<8x1xf32>
    %30 = math.log %29 : vector<8x1xf32>
    %31 = arith.addf %24, %30 : vector<8x1xf32>
    %32 = vector.broadcast %31 : vector<8x1xf32> to vector<8x128xf32>
    %33 = arith.subf %22, %32 : vector<8x128xf32>
    %34 = arith.truncf %33 : vector<8x128xf32> to vector<8x128xbf16>
    %c0_19 = arith.constant 0 : index
    %c0_20 = arith.constant 0 : index
    %35 = vector.load %arg8[%c0_19, %c0_20] : memref<8x128xbf16, #tpu.memory_space<vmem>>, vector<8x128xbf16>
    tpu.vector_store %arg8[%c0_19, %c0_20], %34 {strides = array<i32>} : memref<8x128xbf16, #tpu.memory_space<vmem>>, vector<8x128xbf16>,
    return
  }
  func.func @transform_0(%arg0: i32) -> (i32, i32) {
    %c0_i32 = arith.constant 0 : i32
    %c0_i32_0 = arith.constant 0 : i32
    return %arg0, %c0_i32 : i32, i32
  }
  func.func @transform_1(%arg0: i32) -> (i32, i32) {
    %c0_i32 = arith.constant 0 : i32
    %c0_i32_0 = arith.constant 0 : i32
    %c0_i32_1 = arith.constant 0 : i32
    return %c0_i32, %c0_i32_0 : i32, i32
  }
  func.func @transform_2(%arg0: i32) -> (i32, i32) {
    %c0_i32 = arith.constant 0 : i32
    %c0_i32_0 = arith.constant 0 : i32
    %c0_i32_1 = arith.constant 0 : i32
    return %c0_i32, %c0_i32_0 : i32, i32
  }
  func.func @transform_3(%arg0: i32) -> (i32, i32) {
    %c0_i32 = arith.constant 0 : i32
    %c0_i32_0 = arith.constant 0 : i32
    %c0_i32_1 = arith.constant 0 : i32
    return %c0_i32, %c0_i32_0 : i32, i32
  }
  func.func @transform_4(%arg0: i32) -> (i32, i32) {
    %c0_i32 = arith.constant 0 : i32
    %c0_i32_0 = arith.constant 0 : i32
    %c0_i32_1 = arith.constant 0 : i32
    return %c0_i32, %c0_i32_0 : i32, i32
  }
  func.func @transform_5(%arg0: i32) -> (i32, i32) {
    %c0_i32 = arith.constant 0 : i32
    %c0_i32_0 = arith.constant 0 : i32
    %c0_i32_1 = arith.constant 0 : i32
    return %c0_i32, %c0_i32_0 : i32, i32
  }
  func.func @transform_6(%arg0: i32) -> (i32, i32) {
    %c0_i32 = arith.constant 0 : i32
    %c0_i32_0 = arith.constant 0 : i32
    %c0_i32_1 = arith.constant 0 : i32
    return %c0_i32, %c0_i32_0 : i32, i32
  }
  func.func @transform_7(%arg0: i32) -> (i32, i32) {
    %c0_i32 = arith.constant 0 : i32
    %c0_i32_0 = arith.constant 0 : i32
    return %arg0, %c0_i32 : i32, i32
  }
}

</mosaic_0001>

<bundles_post_ra>
// kernel: mlp_forward.1
= control target key start
LH: loop header
LB: loop body
LE: loop exit
PB: predicated region body
PF: predicated region fallthrough
CT: control target
= control target key end

     0   :  { %12 = vsyncpa [#allocation3], 0  ;;  %s3542_s0 = inlined_call_operand.vmem [shape: f32[8,784], index: 0, kind: input, shape index: {}]   ;;  %s3543_s1 = inlined_call_operand.hbm [shape: bf16[784,512], index: 1, kind: input, shape index: {}]   ;;  %s3544_s2 = inlined_call_operand.vmem [shape: f32[1,512], index: 2, kind: input, shape index: {}]   ;;  %s3545_s3 = inlined_call_operand.vmem [shape: bf16[512,128], index: 3, kind: input, shape index: {}]   ;;  %s3546_s4 = inlined_call_operand.vmem [shape: f32[1,128], index: 4, kind: input, shape index: {}]   ;;  %s3547_s5 = inlined_call_operand.hbm [shape: bf16[128,128], index: 5, kind: input, shape index: {}]   ;;  %s3548_s6 = inlined_call_operand.vmem [shape: f32[1,128], index: 6, kind: input, shape index: {}]   ;;  %s3549_s7 = inlined_call_operand.vmem [shape: bf16[8,128], index: 7, kind: output, shape index: {}]  }
   0x1   :  { %s20_s26 = sshll.u32 %s3543_s1, 4  ;;  %s21_s26 = int_to_ptr.hbm [resolvable:$true] %s20_s26 }
   0x2   :  { %13 = vsyncpa [#allocation5], 0  ;;  %s3297_s27 = smov [#allocation2]   ;;  %s39_s8 = sshll.u32 %s3547_s5, 4  ;;  %s40_s8 = int_to_ptr.hbm [resolvable:$true] %s39_s8 }
   0x3   :  { %s22_s28 = sshll.u32 %s3297_s27, 4  ;;  %s3298_s9 = smov 256   ;;  %s23_s28 = int_to_ptr.vmem [resolvable:$true] %s22_s28 }
   0x4   :  { %s3299_s10 = smov 16   ;;  %s3300_s11 = smov [#allocation4]  }
   0x5   :  { %28 = dma.hbm_to_vmem [thread:$0]  %s21_s26, 25088, %s23_s28, [#allocation3], %s3298_s9, %s3298_s9, %s3299_s10  }
   0x6   :  { %s41_s12 = sshll.u32 %s3300_s11, 4  ;;  %s3301_s13 = smov 64   ;;  %s42_s12 = int_to_ptr.vmem [resolvable:$true] %s41_s12 }
   0x7   :  { %s3302_s14 = smov 4  }
   0x8   :  { %47 = dma.hbm_to_vmem [thread:$0]  %s40_s8, 1024, %s42_s12, [#allocation5], %s3301_s13, %s3301_s13, %s3302_s14  }
   0x9   :  { %3293 = dma.done.wait [#allocation3], 25088  }
   0xa   :  { %3294 = vsyncadd [#allocation3], 4294942208 }
   0xb   :  { %3295 = dma.done.wait [#allocation5], 1024  }
   0xc   :  { %3296 = vsyncadd [#allocation5], 4294966272  ;;  %v2163_v0 = vld [vmem:[#allocation2 + $0xe0] sm:$0xf]  ;;  %v3027_v1 = vld [vmem:[#allocation2 + $0xec] sm:$0xf0] }
   0xd   :  { %v2291_v2 = vld [vmem:[#allocation2 + $0x1e0] sm:$0xf]  ;;  %v2164_v3 = vor.u32 %v3027_v1, %v2163_v0  ;;  %v3059_v4 = vld [vmem:[#allocation2 + $0x1ec] sm:$0xf0]  ;;  %vm1259_vm0 = vcmask 130048  }
   0xe   :  { %v2419_v5 = vld [vmem:[#allocation2 + $0x2e0] sm:$0xf]  ;;  %v3091_v6 = vld [vmem:[#allocation2 + $0x2ec] sm:$0xf0]  ;;  %v2292_v7 = vor.u32 %v3059_v4, %v2291_v2 }
   0xf   :  { %v2420_v8 = vor.u32 %v3091_v6, %v2419_v5  ;;  %v2547_v9 = vld [vmem:[#allocation2 + $0x3e0] sm:$0xf]  ;;  %v3123_v10 = vld [vmem:[#allocation2 + $0x3ec] sm:$0xf0]  ;;  %1263 = vmatpush.bf16.msra.mxu0 %v2164_v3 }
  0x10   :  { %v2147_v11 = vld [vmem:[#allocation2 + $0xc0] sm:$0xf]  ;;  %v2548_v12 = vor.u32 %v3123_v10, %v2547_v9  ;;  %v3023_v13 = vld [vmem:[#allocation2 + $0xcc] sm:$0xf0]  ;;  %1276 = vmatpush.bf16.msra.mxu1 %v2292_v7 }
  0x11   :  { %v2275_v14 = vld [vmem:[#allocation2 + $0x1c0] sm:$0xf]  ;;  %v3055_v15 = vld [vmem:[#allocation2 + $0x1cc] sm:$0xf0]  ;;  %1289 = vmatpush.bf16.msra.mxu2 %v2420_v8  ;;  %v2148_v16 = vor.u32 %v3023_v13, %v2147_v11 }
  0x12   :  { %v2276_v17 = vor.u32 %v3055_v15, %v2275_v14  ;;  %v2403_v18 = vld [vmem:[#allocation2 + $0x2c0] sm:$0xf]  ;;  %v3087_v19 = vld [vmem:[#allocation2 + $0x2cc] sm:$0xf0]  ;;  %1302 = vmatpush.bf16.msra.mxu3 %v2548_v12 }
  0x13   :  { %v2531_v20 = vld [vmem:[#allocation2 + $0x3c0] sm:$0xf]  ;;  %v2404_v21 = vor.u32 %v3087_v19, %v2403_v18  ;;  %v3119_v22 = vld [vmem:[#allocation2 + $0x3cc] sm:$0xf0]  ;;  %1264 = vmatpush.bf16.msra.mxu0 %v2148_v16 }
  0x14   :  { %v2131_v23 = vld [vmem:[#allocation2 + $0xa0] sm:$0xf]  ;;  %v3019_v24 = vld [vmem:[#allocation2 + $0xac] sm:$0xf0]  ;;  %v2532_v25 = vor.u32 %v3119_v22, %v2531_v20  ;;  %1277 = vmatpush.bf16.msra.mxu1 %v2276_v17 }
  0x15   :  { %v2259_v26 = vld [vmem:[#allocation2 + $0x1a0] sm:$0xf]  ;;  %v3051_v27 = vld [vmem:[#allocation2 + $0x1ac] sm:$0xf0]  ;;  %v2132_v29 = vor.u32 %v3019_v24, %v2131_v23  ;;  %1290 = vmatpush.bf16.msra.mxu2 %v2404_v21 }
  0x16   :  { %v2387_v28 = vld [vmem:[#allocation2 + $0x2a0] sm:$0xf]  ;;  %v3083_v30 = vld [vmem:[#allocation2 + $0x2ac] sm:$0xf0]  ;;  %v2260_v33 = vor.u32 %v3051_v27, %v2259_v26  ;;  %1303 = vmatpush.bf16.msra.mxu3 %v2532_v25 }
  0x17   :  { %v2515_v31 = vld [vmem:[#allocation2 + $0x3a0] sm:$0xf]  ;;  %v3115_v32 = vld [vmem:[#allocation2 + $0x3ac] sm:$0xf0]  ;;  %v2388_v34 = vor.u32 %v3083_v30, %v2387_v28  ;;  %1265 = vmatpush.bf16.msra.mxu0 %v2132_v29 }
  0x18   :  { %v2115_v35 = vld [vmem:[#allocation2 + $0x80] sm:$0xf]  ;;  %v3015_v36 = vld [vmem:[#allocation2 + $0x8c] sm:$0xf0]  ;;  %v2516_v38 = vor.u32 %v3115_v32, %v2515_v31  ;;  %1278 = vmatpush.bf16.msra.mxu1 %v2260_v33  ;;  %v3025_v33 = vld [vmem:[#allocation2 + $0xe4] sm:$0xf] }
  0x19   :  { %v2243_v37 = vld [vmem:[#allocation2 + $0x180] sm:$0xf]  ;;  %v3047_v39 = vld [vmem:[#allocation2 + $0x18c] sm:$0xf0]  ;;  %v2116_v44 = vor.u32 %v3015_v36, %v2115_v35  ;;  %1291 = vmatpush.bf16.msra.mxu2 %v2388_v34  ;;  %v2165_v34 = vld [vmem:[#allocation2 + $0xf0] sm:$0xf0] }
  0x1a   :  { %v2371_v40 = vld [vmem:[#allocation2 + $0x280] sm:$0xf]  ;;  %v3079_v41 = vld [vmem:[#allocation2 + $0x28c] sm:$0xf0]  ;;  %v2244_v45 = vor.u32 %v3047_v39, %v2243_v37  ;;  %1304 = vmatpush.bf16.msra.mxu3 %v2516_v38 }
  0x1b   :  { %v2499_v42 = vld [vmem:[#allocation2 + $0x380] sm:$0xf]  ;;  %v3111_v43 = vld [vmem:[#allocation2 + $0x38c] sm:$0xf0]  ;;  %v2372_v46 = vor.u32 %v3079_v41, %v2371_v40  ;;  %1266 = vmatpush.bf16.msra.mxu0 %v2116_v44  ;;  %v2293_v44 = vld [vmem:[#allocation2 + $0x1f0] sm:$0xf0] }
  0x1c   :  { %v2099_v47 = vld [vmem:[#allocation2 + $0x60] sm:$0xf]  ;;  %v3011_v48 = vld [vmem:[#allocation2 + $0x6c] sm:$0xf0]  ;;  %v2500_v50 = vor.u32 %v3111_v43, %v2499_v42  ;;  %1279 = vmatpush.bf16.msra.mxu1 %v2244_v45  ;;  %v3057_v43 = vld [vmem:[#allocation2 + $0x1e4] sm:$0xf] }
  0x1d   :  { %v2227_v49 = vld [vmem:[#allocation2 + $0x160] sm:$0xf]  ;;  %v3043_v51 = vld [vmem:[#allocation2 + $0x16c] sm:$0xf0]  ;;  %v2100_v56 = vor.u32 %v3011_v48, %v2099_v47  ;;  %1292 = vmatpush.bf16.msra.mxu2 %v2372_v46  ;;  %v62_v45 = vld [vmem:[%s3542_s0 + $0x18] sm:$0xff]  ;;  %v2168_v47 = vor.u32 %v3025_v33, %v2165_v34 }
  0x1e   :  { %v2355_v52 = vld [vmem:[#allocation2 + $0x260] sm:$0xf]  ;;  %v3075_v53 = vld [vmem:[#allocation2 + $0x26c] sm:$0xf0]  ;;  %v2228_v57 = vor.u32 %v3043_v51, %v2227_v49  ;;  %1305 = vmatpush.bf16.msra.mxu3 %v2500_v50 }
  0x1f   :  { %v2483_v54 = vld [vmem:[#allocation2 + $0x360] sm:$0xf]  ;;  %v3107_v55 = vld [vmem:[#allocation2 + $0x36c] sm:$0xf0]  ;;  %v2356_v58 = vor.u32 %v3075_v53, %v2355_v52  ;;  %1267 = vmatpush.bf16.msra.mxu0 %v2100_v56  ;;  %v3021_v53 = vld [vmem:[#allocation2 + $0xc4] sm:$0xf] }
  0x20   :  { %v2083_v59 = vld [vmem:[#allocation2 + $0x40] sm:$0xf]  ;;  %v3007_v60 = vld [vmem:[#allocation2 + $0x4c] sm:$0xf0]  ;;  %v2484_v62 = vor.u32 %v3107_v55, %v2483_v54  ;;  %1280 = vmatpush.bf16.msra.mxu1 %v2228_v57  ;;  %v2149_v54 = vld [vmem:[#allocation2 + $0xd0] sm:$0xf0]  ;;  %v3362_v57 = vpack.c.bf16 %v62_v45, %v62_v45 }
  0x21   :  { %v2211_v61 = vld [vmem:[#allocation2 + $0x140] sm:$0xf]  ;;  %v3039_v63 = vld [vmem:[#allocation2 + $0x14c] sm:$0xf0]  ;;  %v2084_v4 = vor.u32 %v3007_v60, %v2083_v59  ;;  %1293 = vmatpush.bf16.msra.mxu2 %v2356_v58  ;;  %v60_v58 = vld [vmem:[%s3542_s0 + $0x8] sm:$0xff]  ;;  %v2296_v59 = vor.u32 %v3057_v43, %v2293_v44 }
  0x22   :  { %v2339_v0 = vld [vmem:[#allocation2 + $0x240] sm:$0xf]  ;;  %v3071_v1 = vld [vmem:[#allocation2 + $0x24c] sm:$0xf0]  ;;  %v2212_v5 = vor.u32 %v3039_v63, %v2211_v61  ;;  %1306 = vmatpush.bf16.msra.mxu3 %v2484_v62  ;;  %v3053_v61 = vld [vmem:[#allocation2 + $0x1c4] sm:$0xf] }
  0x23   :  { %v2467_v2 = vld [vmem:[#allocation2 + $0x340] sm:$0xf]  ;;  %v3103_v3 = vld [vmem:[#allocation2 + $0x34c] sm:$0xf0]  ;;  %v2340_v6 = vor.u32 %v3071_v1, %v2339_v0  ;;  %1268 = vmatpush.bf16.msra.mxu0 %v2084_v4  ;;  %v2277_v62 = vld [vmem:[#allocation2 + $0x1d0] sm:$0xf0]  ;;  %v2152_v0 = vor.u32 %v3021_v53, %v2149_v54 }
  0x24   :  { %v2067_v7 = vld [vmem:[#allocation2 + $0x20] sm:$0xf]  ;;  %v3003_v8 = vld [vmem:[#allocation2 + $0x2c] sm:$0xf0]  ;;  %v2468_v10 = vor.u32 %v3103_v3, %v2467_v2  ;;  %1281 = vmatpush.bf16.msra.mxu1 %v2212_v5  ;;  %v3017_v5 = vld [vmem:[#allocation2 + $0xa4] sm:$0xf] }
  0x25   :  { %v2195_v9 = vld [vmem:[#allocation2 + $0x120] sm:$0xf]  ;;  %v3035_v11 = vld [vmem:[#allocation2 + $0x12c] sm:$0xf0]  ;;  %v2068_v16 = vor.u32 %v3003_v8, %v2067_v7  ;;  %1294 = vmatpush.bf16.msra.mxu2 %v2340_v6  ;;  %v2133_v6 = vld [vmem:[#allocation2 + $0xb0] sm:$0xf0]  ;;  %v3369_v7 = vpack.c.bf16 %v60_v58, %v60_v58  ;;  %v2280_v8 = vor.u32 %v3053_v61, %v2277_v62 }
  0x26   :  { %v2323_v12 = vld [vmem:[#allocation2 + $0x220] sm:$0xf]  ;;  %v3067_v13 = vld [vmem:[#allocation2 + $0x22c] sm:$0xf0]  ;;  %v2196_v20 = vor.u32 %v3035_v11, %v2195_v9  ;;  %1307 = vmatpush.bf16.msra.mxu3 %v2468_v10  ;;  %v3049_v10 = vld [vmem:[#allocation2 + $0x1a4] sm:$0xf] }
  0x27   :  { %v2451_v14 = vld [vmem:[#allocation2 + $0x320] sm:$0xf]  ;;  %v3099_v15 = vld [vmem:[#allocation2 + $0x32c] sm:$0xf0]  ;;  %v2324_v21 = vor.u32 %v3067_v13, %v2323_v12  ;;  %1269 = vmatpush.bf16.msra.mxu0 %v2068_v16  ;;  %v2261_v11 = vld [vmem:[#allocation2 + $0x1b0] sm:$0xf0]  ;;  %v2136_v13 = vor.u32 %v3017_v5, %v2133_v6 }
  0x28   :  { %v2051_v17 = vld [vmem:[#allocation2] sm:$0xf]  ;;  %v2999_v18 = vld [vmem:[#allocation2 + $0xc] sm:$0xf0]  ;;  %v2452_v25 = vor.u32 %v3099_v15, %v2451_v14  ;;  %1282 = vmatpush.bf16.msra.mxu1 %v2196_v20  ;;  %v2264_v20 = vor.u32 %v3049_v10, %v2261_v11  ;;  %v3005_v43 = vld [vmem:[#allocation2 + $0x44] sm:$0xf] }
  0x29   :  { %v2179_v19 = vld [vmem:[#allocation2 + $0x100] sm:$0xf]  ;;  %v3031_v22 = vld [vmem:[#allocation2 + $0x10c] sm:$0xf0]  ;;  %v2052_v32 = vor.u32 %v2999_v18, %v2051_v17  ;;  %1295 = vmatpush.bf16.msra.mxu2 %v2324_v21  ;;  %v3013_v18 = vld [vmem:[#allocation2 + $0x84] sm:$0xf] }
  0x2a   :  { %v2307_v23 = vld [vmem:[#allocation2 + $0x200] sm:$0xf]  ;;  %v3063_v24 = vld [vmem:[#allocation2 + $0x20c] sm:$0xf0]  ;;  %v2180_v36 = vor.u32 %v3031_v22, %v2179_v19  ;;  %1308 = vmatpush.bf16.msra.mxu3 %v2452_v25  ;;  %v2117_v19 = vld [vmem:[#allocation2 + $0x90] sm:$0xf0] }
  0x2b   :  { %v2435_v26 = vld [vmem:[#allocation2 + $0x300] sm:$0xf]  ;;  %v3095_v27 = vld [vmem:[#allocation2 + $0x30c] sm:$0xf0]  ;;  %v2308_v37 = vor.u32 %v3063_v24, %v2307_v23  ;;  %1270 = vmatpush.bf16.msra.mxu0 %v2052_v32  ;;  %v3045_v22 = vld [vmem:[#allocation2 + $0x184] sm:$0xf]  ;;  %v2120_v25 = vor.u32 %v3013_v18, %v2117_v19 }
  0x2c   :  { %v2675_v28 = vld [vmem:[#allocation2 + $0x4e0] sm:$0xf]  ;;  %v3155_v29 = vld [vmem:[#allocation2 + $0x4ec] sm:$0xf0]  ;;  %v2436_v41 = vor.u32 %v3095_v27, %v2435_v26  ;;  %1283 = vmatpush.bf16.msra.mxu1 %v2180_v36  ;;  %v2245_v23 = vld [vmem:[#allocation2 + $0x190] sm:$0xf0] }
  0x2d   :  { %v2803_v30 = vld [vmem:[#allocation2 + $0x5e0] sm:$0xf]  ;;  %v3187_v31 = vld [vmem:[#allocation2 + $0x5ec] sm:$0xf0]  ;;  %v2676_v42 = vor.u32 %v3155_v29, %v2675_v28  ;;  %1296 = vmatpush.bf16.msra.mxu2 %v2308_v37  ;;  %v2248_v33 = vor.u32 %v3045_v22, %v2245_v23  ;;  %v2229_v36 = vld [vmem:[#allocation2 + $0x170] sm:$0xf0] }
  0x2e   :  { %v61_v35 = vld [vmem:[%s3542_s0 + $0x10] sm:$0xff]  ;;  %v2819_v38 = vld [vmem:[#allocation2 + $0x600] sm:$0xf]  ;;  %v2804_v46 = vor.u32 %v3187_v31, %v2803_v30  ;;  %1309 = vmatpush.bf16.msra.mxu3 %v2436_v41  ;;  %v3009_v30 = vld [vmem:[#allocation2 + $0x64] sm:$0xf] }
  0x2f   :  { %v3191_v39 = vld [vmem:[#allocation2 + $0x60c] sm:$0xf0]  ;;  %v59_v40 = vld [vmem:[%s3542_s0] sm:$0xff]  ;;  %v3358_v51 = vpack.c.bf16 %v61_v35, %v61_v35  ;;  %1315 = vmatpush.bf16.msrb.mxu0 %v2676_v42  ;;  %1284 = vmatmul.bf16.vlgmr.msra.gmra.mxu1 %v3369_v7  ;;  %v2101_v31 = vld [vmem:[#allocation2 + $0x70] sm:$0xf0] }
  0x30   :  { %v2659_v48 = vld [vmem:[#allocation2 + $0x4c0] sm:$0xf]  ;;  %v3151_v49 = vld [vmem:[#allocation2 + $0x4cc] sm:$0xf0]  ;;  %v3360_v55 = vpack.c.bf16 %v59_v40, %v59_v40  ;;  %v2820_v56 = vor.u32 %v3191_v39, %v2819_v38  ;;  %1328 = vmatpush.bf16.msrb.mxu1 %v2804_v46  ;;  %v3041_v35 = vld [vmem:[#allocation2 + $0x164] sm:$0xf]  ;;  %v2104_v38 = vor.u32 %v3009_v30, %v2101_v31 }
  0x31   :  { %v2787_v50 = vld [vmem:[#allocation2 + $0x5c0] sm:$0xf]  ;;  %v3183_v52 = vld [vmem:[#allocation2 + $0x5cc] sm:$0xf0]  ;;  %v2660_v60 = vor.u32 %v3151_v49, %v2659_v48  ;;  %1297 = vmatmul.bf16.vlgmr.msra.gmra.mxu2 %v3358_v51  ;;  %1310 = vmatmul.bf16.vlgmr.msra.gmra.mxu3 %v3362_v57  ;;  %v2085_v44 = vld [vmem:[#allocation2 + $0x50] sm:$0xf0]  ;;  %v2232_v46 = vor.u32 %v3041_v35, %v2229_v36 }
  0x32   :  { %1354 = vmatpush.bf16.msrb.mxu3 %v2168_v47  ;;  %v2788_v63 = vor.u32 %v3183_v52, %v2787_v50  ;;  %v2643_v1 = vld [vmem:[#allocation2 + $0x4a0] sm:$0xf]  ;;  %v3147_v2 = vld [vmem:[#allocation2 + $0x4ac] sm:$0xf0]  ;;  %1271 = vmatmul.bf16.vlgmr.msra.gmra.mxu0 %v3360_v55  ;;  %v3037_v48 = vld [vmem:[#allocation2 + $0x144] sm:$0xf]  ;;  %v2088_v52 = vor.u32 %v3005_v43, %v2085_v44 }
  0x33   :  { %v2771_v3 = vld [vmem:[#allocation2 + $0x5a0] sm:$0xf]  ;;  %v3179_v4 = vld [vmem:[#allocation2 + $0x5ac] sm:$0xf0]  ;;  %1348 = vmatpush.bf16.msrb.mxu2 %v2820_v56  ;;  %1316 = vmatpush.bf16.msrb.mxu0 %v2660_v60  ;;  %v2644_v9 = vor.u32 %v3147_v2, %v2643_v1  ;;  %v2213_v49 = vld [vmem:[#allocation2 + $0x150] sm:$0xf0] }
  0x34   :  { %1329 = vmatpush.bf16.msrb.mxu1 %v2788_v63  ;;  %v2772_v12 = vor.u32 %v3179_v4, %v2771_v3  ;;  %v2627_v14 = vld [vmem:[#allocation2 + $0x480] sm:$0xf]  ;;  %v3143_v15 = vld [vmem:[#allocation2 + $0x48c] sm:$0xf0]  ;;  %v2069_v60 = vld [vmem:[#allocation2 + $0x30] sm:$0xf0]  ;;  %v2216_v61 = vor.u32 %v3037_v48, %v2213_v49 }
  0x35   :  { %v2755_v16 = vld [vmem:[#allocation2 + $0x580] sm:$0xf]  ;;  %v3175_v17 = vld [vmem:[#allocation2 + $0x58c] sm:$0xf0]  ;;  %v2628_v21 = vor.u32 %v3143_v15, %v2627_v14  ;;  %v3033_v63 = vld [vmem:[#allocation2 + $0x124] sm:$0xf] }
  0x36   :  { %1355 = vmatpush.bf16.msrb.mxu3 %v2152_v0  ;;  %v2756_v24 = vor.u32 %v3175_v17, %v2755_v16  ;;  %v2611_v26 = vld [vmem:[#allocation2 + $0x460] sm:$0xf]  ;;  %v3139_v27 = vld [vmem:[#allocation2 + $0x46c] sm:$0xf0]  ;;  %v2197_v0 = vld [vmem:[#allocation2 + $0x130] sm:$0xf0] }
  0x37   :  { %1367 = vmatpush.bf16.msra.mxu2 %v2296_v59  ;;  %1317 = vmatpush.bf16.msrb.mxu0 %v2644_v9  ;;  %v2739_v28 = vld [vmem:[#allocation2 + $0x560] sm:$0xf]  ;;  %v3171_v29 = vld [vmem:[#allocation2 + $0x56c] sm:$0xf0]  ;;  %v2612_v34 = vor.u32 %v3139_v27, %v2611_v26  ;;  %v3001_v59 = vld [vmem:[#allocation2 + $0x24] sm:$0xf]  ;;  %v2200_v14 = vor.u32 %v3033_v63, %v2197_v0 }
  0x38   :  { %1330 = vmatpush.bf16.msrb.mxu1 %v2772_v12  ;;  %v65_v32 = vld [vmem:[%s3542_s0 + $0x30] sm:$0xff]  ;;  %v2740_v37 = vor.u32 %v3171_v29, %v2739_v28  ;;  %v2595_v39 = vld [vmem:[#allocation2 + $0x440] sm:$0xf]  ;;  %v2072_v3 = vor.u32 %v3001_v59, %v2069_v60  ;;  %v3089_v10 = vld [vmem:[#allocation2 + $0x2e4] sm:$0xf] }
  0x39   :  { %v3135_v40 = vld [vmem:[#allocation2 + $0x44c] sm:$0xf0]  ;;  %v2723_v41 = vld [vmem:[#allocation2 + $0x540] sm:$0xf]  ;;  %v3376_v45 = vpack.c.bf16 %v65_v32, %v65_v32  ;;  %v2053_v9 = vld [vmem:[#allocation2 + $0x10] sm:$0xf0] }
  0x3a   :  { %1356 = vmatpush.bf16.msrb.mxu3 %v2136_v13  ;;  %v3167_v42 = vld [vmem:[#allocation2 + $0x54c] sm:$0xf0]  ;;  %v2596_v47 = vor.u32 %v3135_v40, %v2595_v39  ;;  %v2579_v53 = vld [vmem:[#allocation2 + $0x420] sm:$0xf]  ;;  %v2421_v11 = vld [vmem:[#allocation2 + $0x2f0] sm:$0xf0] }
  0x3b   :  { %1368 = vmatpush.bf16.msra.mxu2 %v2280_v8  ;;  %1318 = vmatpush.bf16.msrb.mxu0 %v2628_v21  ;;  %v2724_v50 = vor.u32 %v3167_v42, %v2723_v41  ;;  %v3131_v54 = vld [vmem:[#allocation2 + $0x42c] sm:$0xf0]  ;;  %v2707_v56 = vld [vmem:[#allocation2 + $0x520] sm:$0xf]  ;;  %v2997_v8 = vld [vmem:[#allocation2 + $0x4] sm:$0xf] }
  0x3c   :  { %1331 = vmatpush.bf16.msrb.mxu1 %v2756_v24  ;;  %v3163_v58 = vld [vmem:[#allocation2 + $0x52c] sm:$0xf0]  ;;  %v2580_v62 = vor.u32 %v3131_v54, %v2579_v53  ;;  %v2563_v1 = vld [vmem:[#allocation2 + $0x400] sm:$0xf]  ;;  %v3121_v12 = vld [vmem:[#allocation2 + $0x3e4] sm:$0xf]  ;;  %v2424_v24 = vor.u32 %v3089_v10, %v2421_v11 }
  0x3d   :  { %v2708_v2 = vor.u32 %v3163_v58, %v2707_v56  ;;  %v3127_v4 = vld [vmem:[#allocation2 + $0x40c] sm:$0xf0]  ;;  %v2691_v5 = vld [vmem:[#allocation2 + $0x500] sm:$0xf]  ;;  %v2549_v13 = vld [vmem:[#allocation2 + $0x3f0] sm:$0xf0] }
  0x3e   :  { %1357 = vmatpush.bf16.msrb.mxu3 %v2120_v25  ;;  %v3159_v6 = vld [vmem:[#allocation2 + $0x50c] sm:$0xf0]  ;;  %v2564_v15 = vor.u32 %v3127_v4, %v2563_v1  ;;  %v3153_v16 = vld [vmem:[#allocation2 + $0x4e4] sm:$0xf]  ;;  %v2677_v17 = vld [vmem:[#allocation2 + $0x4f0] sm:$0xf0]  ;;  %v2552_v25 = vor.u32 %v3121_v12, %v2549_v13 }
  0x3f   :  { %1369 = vmatpush.bf16.msra.mxu2 %v2264_v20  ;;  %1319 = vmatpush.bf16.msrb.mxu0 %v2612_v34  ;;  %v63_v18 = vld [vmem:[%s3542_s0 + $0x20] sm:$0xff]  ;;  %v2692_v19 = vor.u32 %v3159_v6, %v2691_v5  ;;  %v2056_v20 = vor.u32 %v2997_v8, %v2053_v9  ;;  %v2181_v22 = vld [vmem:[#allocation2 + $0x110] sm:$0xf0]  ;;  %v64_v23 = vld [vmem:[%s3542_s0 + $0x28] sm:$0xff]  ;;  %v2680_v29 = vor.u32 %v3153_v16, %v2677_v17 }
  0x40   :  { %1332 = vmatpush.bf16.msrb.mxu1 %v2740_v37  ;;  %v3029_v21 = vld [vmem:[#allocation2 + $0x104] sm:$0xf]  ;;  %v2805_v27 = vld [vmem:[#allocation2 + $0x5f0] sm:$0xf0]  ;;  %v3386_v30 = vpack.c.bf16 %v63_v18, %v63_v18  ;;  %v3388_v35 = vpack.c.bf16 %v64_v23, %v64_v23 }
  0x41   :  { %2833 = vmatmul.msk.bf16.vlgmr.msrb.gmra.mxu2 %vm1259_vm0, %v3376_v45  ;;  %v3185_v26 = vld [vmem:[#allocation2 + $0x5e4] sm:$0xf]  ;;  %v2405_v31 = vld [vmem:[#allocation2 + $0x2d0] sm:$0xf0]  ;;  %v2184_v34 = vor.u32 %v3029_v21, %v2181_v22 }
  0x42   :  { %1358 = vmatpush.bf16.msrb.mxu3 %v2104_v38  ;;  %v3085_v28 = vld [vmem:[#allocation2 + $0x2c4] sm:$0xf]  ;;  %v2661_v37 = vld [vmem:[#allocation2 + $0x4d0] sm:$0xf0]  ;;  %v2808_v38 = vor.u32 %v3185_v26, %v2805_v27 }
  0x43   :  { %1370 = vmatpush.bf16.msra.mxu2 %v2248_v33  ;;  %1320 = vmatpush.bf16.msrb.mxu0 %v2596_v47  ;;  %v3117_v32 = vld [vmem:[#allocation2 + $0x3c4] sm:$0xf]  ;;  %v2533_v33 = vld [vmem:[#allocation2 + $0x3d0] sm:$0xf0]  ;;  %v2408_v39 = vor.u32 %v3085_v28, %v2405_v31 }
  0x44   :  { %1333 = vmatpush.bf16.msrb.mxu1 %v2724_v50  ;;  %v3149_v36 = vld [vmem:[#allocation2 + $0x4c4] sm:$0xf]  ;;  %v2536_v40 = vor.u32 %v3117_v32, %v2533_v33  ;;  %v2789_v42 = vld [vmem:[#allocation2 + $0x5d0] sm:$0xf0] }
  0x45   :  { %v3181_v41 = vld [vmem:[#allocation2 + $0x5c4] sm:$0xf]  ;;  %v2664_v44 = vor.u32 %v3149_v36, %v2661_v37  ;;  %v2517_v48 = vld [vmem:[#allocation2 + $0x3b0] sm:$0xf0] }
  0x46   :  { %1359 = vmatpush.bf16.msrb.mxu3 %v2088_v52  ;;  %v3081_v43 = vld [vmem:[#allocation2 + $0x2a4] sm:$0xf]  ;;  %v2645_v50 = vld [vmem:[#allocation2 + $0x4b0] sm:$0xf0]  ;;  %v2792_v52 = vor.u32 %v3181_v41, %v2789_v42 }
  0x47   :  { %1371 = vmatpush.bf16.msra.mxu2 %v2232_v46  ;;  %1321 = vmatpush.bf16.msrb.mxu0 %v2580_v62  ;;  %v2389_v46 = vld [vmem:[#allocation2 + $0x2b0] sm:$0xf0]  ;;  %v3113_v47 = vld [vmem:[#allocation2 + $0x3a4] sm:$0xf] }
  0x48   :  { %1334 = vmatpush.bf16.msrb.mxu1 %v2708_v2  ;;  %v3145_v49 = vld [vmem:[#allocation2 + $0x4a4] sm:$0xf]  ;;  %v2392_v53 = vor.u32 %v3081_v43, %v2389_v46  ;;  %v2520_v54 = vor.u32 %v3113_v47, %v2517_v48  ;;  %v2773_v58 = vld [vmem:[#allocation2 + $0x5b0] sm:$0xf0] }
  0x49   :  { %v3177_v56 = vld [vmem:[#allocation2 + $0x5a4] sm:$0xf]  ;;  %v2648_v60 = vor.u32 %v3145_v49, %v2645_v50  ;;  %v2501_v63 = vld [vmem:[#allocation2 + $0x390] sm:$0xf0] }
  0x4a   :  { %1360 = vmatpush.bf16.msrb.mxu3 %v2072_v3  ;;  %v3077_v59 = vld [vmem:[#allocation2 + $0x284] sm:$0xf]  ;;  %v2629_v1 = vld [vmem:[#allocation2 + $0x490] sm:$0xf0]  ;;  %v2776_v2 = vor.u32 %v3177_v56, %v2773_v58  ;;  %v2171_v56 = vld [vmem:[#allocation2 + $0xe8] sm:$0xf] }
  0x4b   :  { %1372 = vmatpush.bf16.msra.mxu2 %v2216_v61  ;;  %1322 = vmatpush.bf16.msrb.mxu0 %v2564_v15  ;;  %v2373_v61 = vld [vmem:[#allocation2 + $0x290] sm:$0xf0]  ;;  %v3109_v62 = vld [vmem:[#allocation2 + $0x384] sm:$0xf]  ;;  %v3028_v58 = vld [vmem:[#allocation2 + $0xf4] sm:$0xf0] }
  0x4c   :  { %1335 = vmatpush.bf16.msrb.mxu1 %v2692_v19  ;;  %v3141_v0 = vld [vmem:[#allocation2 + $0x484] sm:$0xf]  ;;  %v2376_v3 = vor.u32 %v3077_v59, %v2373_v61  ;;  %v2504_v4 = vor.u32 %v3109_v62, %v2501_v63  ;;  %v2757_v6 = vld [vmem:[#allocation2 + $0x590] sm:$0xf0]  ;;  %v2299_v59 = vld [vmem:[#allocation2 + $0x1e8] sm:$0xf] }
  0x4d   :  { %v3173_v5 = vld [vmem:[#allocation2 + $0x584] sm:$0xf]  ;;  %v2632_v9 = vor.u32 %v3141_v0, %v2629_v1  ;;  %v2357_v10 = vld [vmem:[#allocation2 + $0x270] sm:$0xf0]  ;;  %v3060_v61 = vld [vmem:[#allocation2 + $0x1f4] sm:$0xf0] }
  0x4e   :  { %1361 = vmatpush.bf16.msrb.mxu3 %v2056_v20  ;;  %1323 = vmatmul.bf16.vlgmr.msrb.gmra.mxu0 %v3386_v30  ;;  %v3073_v8 = vld [vmem:[#allocation2 + $0x264] sm:$0xf]  ;;  %v2485_v12 = vld [vmem:[#allocation2 + $0x370] sm:$0xf0]  ;;  %v2760_v15 = vor.u32 %v3173_v5, %v2757_v6  ;;  %v2172_v6 = vor.u32 %v3028_v58, %v2171_v56  ;;  %v3012_v56 = vld [vmem:[#allocation2 + $0x74] sm:$0xf0] }
  0x4f   :  { %1373 = vmatpush.bf16.msra.mxu2 %v2200_v14  ;;  %1380 = vmatpush.bf16.msra.mxu0 %v2424_v24  ;;  %v3105_v11 = vld [vmem:[#allocation2 + $0x364] sm:$0xf]  ;;  %v2613_v14 = vld [vmem:[#allocation2 + $0x470] sm:$0xf0]  ;;  %v2360_v16 = vor.u32 %v3073_v8, %v2357_v10  ;;  %v3092_v8 = vld [vmem:[#allocation2 + $0x2f4] sm:$0xf0] }
  0x50   :  { %1393 = vmatpush.bf16.msra.mxu1 %v2552_v25  ;;  %v3137_v13 = vld [vmem:[#allocation2 + $0x464] sm:$0xf]  ;;  %v2488_v17 = vor.u32 %v3105_v11, %v2485_v12  ;;  %v2741_v19 = vld [vmem:[#allocation2 + $0x570] sm:$0xf0]  ;;  %v3124_v10 = vld [vmem:[#allocation2 + $0x3f4] sm:$0xf0]  ;;  %v2300_v11 = vor.u32 %v3060_v61, %v2299_v59 }
  0x51   :  { %1336 = vmatmul.bf16.vlgmr.msrb.gmra.mxu1 %v3388_v35  ;;  %1362 = vmatmul.bf16.vlgmr.msrb.gmra.mxu3 %v3360_v55  ;;  %v3169_v18 = vld [vmem:[#allocation2 + $0x564] sm:$0xf]  ;;  %v2616_v21 = vor.u32 %v3137_v13, %v2613_v14  ;;  %v2341_v22 = vld [vmem:[#allocation2 + $0x250] sm:$0xf0]  ;;  %v2155_v13 = vld [vmem:[#allocation2 + $0xc8] sm:$0xf] }
  0x52   :  { %1406 = vmatpush.bf16.msra.mxu3 %v2680_v29  ;;  %v3069_v20 = vld [vmem:[#allocation2 + $0x244] sm:$0xf]  ;;  %v2469_v24 = vld [vmem:[#allocation2 + $0x350] sm:$0xf0]  ;;  %v2744_v27 = vor.u32 %v3169_v18, %v2741_v19  ;;  %v3024_v14 = vld [vmem:[#allocation2 + $0xd4] sm:$0xf0] }
  0x53   :  { %1374 = vmatpush.bf16.msra.mxu2 %v2184_v34  ;;  %1381 = vmatpush.bf16.msra.mxu0 %v2408_v39  ;;  %v3101_v23 = vld [vmem:[#allocation2 + $0x344] sm:$0xf]  ;;  %v2597_v26 = vld [vmem:[#allocation2 + $0x450] sm:$0xf0]  ;;  %v2344_v28 = vor.u32 %v3069_v20, %v2341_v22  ;;  %v2411_v20 = vld [vmem:[#allocation2 + $0x2c8] sm:$0xf] }
  0x54   :  { %1394 = vmatpush.bf16.msra.mxu1 %v2536_v40  ;;  %v3133_v25 = vld [vmem:[#allocation2 + $0x444] sm:$0xf]  ;;  %v2472_v29 = vor.u32 %v3101_v23, %v2469_v24  ;;  %v2725_v32 = vld [vmem:[#allocation2 + $0x550] sm:$0xf0]  ;;  %v3088_v22 = vld [vmem:[#allocation2 + $0x2d4] sm:$0xf0] }
  0x55   :  { %v3165_v31 = vld [vmem:[#allocation2 + $0x544] sm:$0xf]  ;;  %v2600_v34 = vor.u32 %v3133_v25, %v2597_v26  ;;  %v2325_v36 = vld [vmem:[#allocation2 + $0x230] sm:$0xf0]  ;;  %v2539_v23 = vld [vmem:[#allocation2 + $0x3c8] sm:$0xf] }
  0x56   :  { %1407 = vmatpush.bf16.msra.mxu3 %v2664_v44  ;;  %1375 = vmatmul.bf16.vlgmr.msra.gmra.mxu2 %v3369_v7  ;;  %v3065_v33 = vld [vmem:[#allocation2 + $0x224] sm:$0xf]  ;;  %v2581_v40 = vld [vmem:[#allocation2 + $0x430] sm:$0xf0]  ;;  %v2728_v41 = vor.u32 %v3165_v31, %v2725_v32  ;;  %v3120_v24 = vld [vmem:[#allocation2 + $0x3d4] sm:$0xf0]  ;;  %v2412_v31 = vor.u32 %v3088_v22, %v2411_v20 }
  0x57   :  { %1419 = vmatpush.bf16.msrb.mxu2 %v2808_v38  ;;  %1382 = vmatpush.bf16.msra.mxu0 %v2392_v53  ;;  %v3097_v37 = vld [vmem:[#allocation2 + $0x324] sm:$0xf]  ;;  %v2453_v38 = vld [vmem:[#allocation2 + $0x330] sm:$0xf0]  ;;  %v2328_v44 = vor.u32 %v3065_v33, %v2325_v36  ;;  %v2139_v26 = vld [vmem:[#allocation2 + $0xa8] sm:$0xf]  ;;  %v2540_v32 = vor.u32 %v3120_v24, %v2539_v23 }
  0x58   :  { %1395 = vmatpush.bf16.msra.mxu1 %v2520_v54  ;;  %v3129_v39 = vld [vmem:[#allocation2 + $0x424] sm:$0xf]  ;;  %v2709_v43 = vld [vmem:[#allocation2 + $0x530] sm:$0xf0]  ;;  %v2456_v46 = vor.u32 %v3097_v37, %v2453_v38  ;;  %v2395_v33 = vld [vmem:[#allocation2 + $0x2a8] sm:$0xf] }
  0x59   :  { %v3161_v42 = vld [vmem:[#allocation2 + $0x524] sm:$0xf]  ;;  %v2309_v48 = vld [vmem:[#allocation2 + $0x210] sm:$0xf0]  ;;  %v2584_v50 = vor.u32 %v3129_v39, %v2581_v40  ;;  %v3084_v36 = vld [vmem:[#allocation2 + $0x2b4] sm:$0xf0] }
  0x5a   :  { %1408 = vmatpush.bf16.msra.mxu3 %v2648_v60  ;;  %v3061_v47 = vld [vmem:[#allocation2 + $0x204] sm:$0xf]  ;;  %v2565_v54 = vld [vmem:[#allocation2 + $0x410] sm:$0xf0]  ;;  %v2712_v60 = vor.u32 %v3161_v42, %v2709_v43  ;;  %v2523_v37 = vld [vmem:[#allocation2 + $0x3a8] sm:$0xf] }
  0x5b   :  { %1420 = vmatpush.bf16.msrb.mxu2 %v2792_v52  ;;  %1383 = vmatpush.bf16.msra.mxu0 %v2376_v3  ;;  %v3093_v49 = vld [vmem:[#allocation2 + $0x304] sm:$0xf]  ;;  %v2437_v52 = vld [vmem:[#allocation2 + $0x310] sm:$0xf0]  ;;  %v2312_v0 = vor.u32 %v3061_v47, %v2309_v48  ;;  %v3116_v38 = vld [vmem:[#allocation2 + $0x3b4] sm:$0xf0] }
  0x5c   :  { %1396 = vmatpush.bf16.msra.mxu1 %v2504_v4  ;;  %v3125_v53 = vld [vmem:[#allocation2 + $0x404] sm:$0xf]  ;;  %v2821_v63 = vld [vmem:[#allocation2 + $0x610] sm:$0xf0]  ;;  %v2440_v1 = vor.u32 %v3093_v49, %v2437_v52  ;;  %v2427_v4 = vld [vmem:[#allocation2 + $0x2e8] sm:$0xf] }
  0x5d   :  { %v3189_v62 = vld [vmem:[#allocation2 + $0x604] sm:$0xf]  ;;  %v2693_v3 = vld [vmem:[#allocation2 + $0x510] sm:$0xf0]  ;;  %v2568_v5 = vor.u32 %v3125_v53, %v2565_v54  ;;  %v2428_v18 = vor.u32 %v3092_v8, %v2427_v4  ;;  %v2123_v40 = vld [vmem:[#allocation2 + $0x88] sm:$0xf] }
  0x5e   :  { %1409 = vmatpush.bf16.msra.mxu3 %v2632_v9  ;;  %v2555_v9 = vld [vmem:[#allocation2 + $0x3e8] sm:$0xf]  ;;  %v2824_v12 = vor.u32 %v3189_v62, %v2821_v63  ;;  %v3048_v43 = vld [vmem:[#allocation2 + $0x194] sm:$0xf0] }
  0x5f   :  { %1421 = vmatpush.bf16.msrb.mxu2 %v2776_v2  ;;  %1384 = vmatpush.bf16.msra.mxu0 %v2360_v16  ;;  %v3157_v2 = vld [vmem:[#allocation2 + $0x504] sm:$0xf]  ;;  %v2283_v16 = vld [vmem:[#allocation2 + $0x1c8] sm:$0xf]  ;;  %v2556_v19 = vor.u32 %v3124_v10, %v2555_v9  ;;  %v3080_v49 = vld [vmem:[#allocation2 + $0x294] sm:$0xf0] }
  0x60   :  { %1397 = vmatpush.bf16.msra.mxu1 %v2488_v17  ;;  %v3056_v17 = vld [vmem:[#allocation2 + $0x1d4] sm:$0xf0]  ;;  %v2251_v42 = vld [vmem:[#allocation2 + $0x188] sm:$0xf] }
  0x61   :  { %v2284_v25 = vor.u32 %v3056_v17, %v2283_v16  ;;  %v2379_v47 = vld [vmem:[#allocation2 + $0x288] sm:$0xf]  ;;  %v3112_v52 = vld [vmem:[#allocation2 + $0x394] sm:$0xf0]  ;;  %v2252_v53 = vor.u32 %v3048_v43, %v2251_v42 }
  0x62   :  { %1410 = vmatpush.bf16.msra.mxu3 %v2616_v21  ;;  %v2156_v21 = vor.u32 %v3024_v14, %v2155_v13  ;;  %v2107_v54 = vld [vmem:[#allocation2 + $0x68] sm:$0xf]  ;;  %v3044_v59 = vld [vmem:[#allocation2 + $0x174] sm:$0xf0] }
  0x63   :  { %1422 = vmatpush.bf16.msrb.mxu2 %v2760_v15  ;;  %1385 = vmatpush.bf16.msra.mxu0 %v2344_v28  ;;  %v2696_v15 = vor.u32 %v3157_v2, %v2693_v3  ;;  %v2267_v28 = vld [vmem:[#allocation2 + $0x1a8] sm:$0xf]  ;;  %v2108_v63 = vor.u32 %v3012_v56, %v2107_v54  ;;  %v3108_v2 = vld [vmem:[#allocation2 + $0x374] sm:$0xf0] }
  0x64   :  { %1398 = vmatpush.bf16.msra.mxu1 %v2472_v29  ;;  %v3052_v29 = vld [vmem:[#allocation2 + $0x1b4] sm:$0xf0]  ;;  %v2235_v58 = vld [vmem:[#allocation2 + $0x168] sm:$0xf] }
  0x65   :  { %v2268_v39 = vor.u32 %v3052_v29, %v2267_v28  ;;  %v2363_v62 = vld [vmem:[#allocation2 + $0x268] sm:$0xf]  ;;  %v2236_v3 = vor.u32 %v3044_v59, %v2235_v58  ;;  %v3040_v8 = vld [vmem:[#allocation2 + $0x154] sm:$0xf0] }
  0x66   :  { %1411 = vmatpush.bf16.msra.mxu3 %v2600_v34  ;;  %v2091_v4 = vld [vmem:[#allocation2 + $0x48] sm:$0xf]  ;;  %v3072_v13 = vld [vmem:[#allocation2 + $0x254] sm:$0xf0] }
  0x67   :  { %1423 = vmatpush.bf16.msrb.mxu2 %v2744_v27  ;;  %1386 = vmatpush.bf16.msra.mxu0 %v2328_v44  ;;  %v3020_v27 = vld [vmem:[#allocation2 + $0xb4] sm:$0xf0]  ;;  %v2396_v44 = vor.u32 %v3084_v36, %v2395_v33  ;;  %v2475_v14 = vld [vmem:[#allocation2 + $0x348] sm:$0xf] }
  0x68   :  { %1399 = vmatpush.bf16.msra.mxu1 %v2456_v46  ;;  %v2140_v34 = vor.u32 %v3020_v27, %v2139_v26  ;;  %v2524_v46 = vor.u32 %v3116_v38, %v2523_v37  ;;  %v2075_v17 = vld [vmem:[#allocation2 + $0x28] sm:$0xf]  ;;  %v3036_v20 = vld [vmem:[#allocation2 + $0x134] sm:$0xf0] }
  0x69   :  { %v2331_v23 = vld [vmem:[#allocation2 + $0x228] sm:$0xf]  ;;  %v3068_v24 = vld [vmem:[#allocation2 + $0x234] sm:$0xf0] }
  0x6a   :  { %1412 = vmatpush.bf16.msra.mxu3 %v2584_v50  ;;  %v2507_v50 = vld [vmem:[#allocation2 + $0x388] sm:$0xf]  ;;  %v3100_v27 = vld [vmem:[#allocation2 + $0x334] sm:$0xf0]  ;;  %v2332_v38 = vor.u32 %v3068_v24, %v2331_v23 }
  0x6b   :  { %1424 = vmatpush.bf16.msrb.mxu2 %v2728_v41  ;;  %1387 = vmatpush.bf16.msra.mxu0 %v2312_v0  ;;  %v3016_v41 = vld [vmem:[#allocation2 + $0x94] sm:$0xf0]  ;;  %v2508_v61 = vor.u32 %v3112_v52, %v2507_v50  ;;  %v2459_v26 = vld [vmem:[#allocation2 + $0x328] sm:$0xf]  ;;  %v2173_v50 = vld [vmem:[#allocation2 + $0xf8] sm:$0xf0] }
  0x6c   :  { %1400 = vmatpush.bf16.msra.mxu1 %v2440_v1  ;;  %v2124_v48 = vor.u32 %v3016_v41, %v2123_v40  ;;  %v3076_v0 = vld [vmem:[#allocation2 + $0x274] sm:$0xf0]  ;;  %v2491_v1 = vld [vmem:[#allocation2 + $0x368] sm:$0xf] }
  0x6d   :  { %v2364_v9 = vor.u32 %v3076_v0, %v2363_v62  ;;  %v2492_v10 = vor.u32 %v3108_v2, %v2491_v1  ;;  %v2059_v28 = vld [vmem:[#allocation2 + $0x8] sm:$0xf]  ;;  %v3032_v33 = vld [vmem:[#allocation2 + $0x114] sm:$0xf0]  ;;  %v3058_v1 = vld [vmem:[#allocation2 + $0x1ec] sm:$0xf] }
  0x6e   :  { %1413 = vmatpush.bf16.msra.mxu3 %v2568_v5  ;;  %1388 = vmatmul.bf16.vlgmr.msra.gmra.mxu0 %v3358_v51  ;;  %v3008_v5 = vld [vmem:[#allocation2 + $0x54] sm:$0xf0]  ;;  %v2811_v37 = vld [vmem:[#allocation2 + $0x5e8] sm:$0xf]  ;;  %v2301_v2 = vld [vmem:[#allocation2 + $0x1f8] sm:$0xf0] }
  0x6f   :  { %1425 = vmatpush.bf16.msrb.mxu2 %v2712_v60  ;;  %1439 = vmatpush.bf16.msrb.mxu0 %v2824_v12  ;;  %v2380_v60 = vor.u32 %v3080_v49, %v2379_v47  ;;  %v2092_v12 = vor.u32 %v3008_v5, %v2091_v4  ;;  %v3156_v36 = vld [vmem:[#allocation2 + $0x4f4] sm:$0xf0]  ;;  %v2315_v41 = vld [vmem:[#allocation2 + $0x208] sm:$0xf]  ;;  %v3026_v47 = vld [vmem:[#allocation2 + $0xec] sm:$0xf] }
  0x70   :  { %1445 = vmatpush.bf16.msrb.mxu1 %v2172_v6  ;;  %v2219_v6 = vld [vmem:[#allocation2 + $0x148] sm:$0xf]  ;;  %v3188_v40 = vld [vmem:[#allocation2 + $0x5f4] sm:$0xf0]  ;;  %v3022_v4 = vld [vmem:[#allocation2 + $0xcc] sm:$0xf] }
  0x71   :  { %1414 = vmatmul.bf16.vlgmr.msra.gmra.mxu3 %v3386_v30  ;;  %1401 = vmatmul.bf16.vlgmr.msra.gmra.mxu1 %v3362_v57  ;;  %v2220_v16 = vor.u32 %v3040_v8, %v2219_v6  ;;  %v3064_v42 = vld [vmem:[#allocation2 + $0x214] sm:$0xf0]  ;;  %v2827_v52 = vld [vmem:[#allocation2 + $0x608] sm:$0xf]  ;;  %v2812_v54 = vor.u32 %v3188_v40, %v2811_v37  ;;  %v2157_v5 = vld [vmem:[#allocation2 + $0xd8] sm:$0xf0] }
  0x72   :  { %1458 = vmatpush.bf16.msrb.mxu3 %v2300_v11  ;;  %v2347_v11 = vld [vmem:[#allocation2 + $0x248] sm:$0xf]  ;;  %v3152_v58 = vld [vmem:[#allocation2 + $0x4d4] sm:$0xf0]  ;;  %v2316_v59 = vor.u32 %v3064_v42, %v2315_v41  ;;  %v3046_v40 = vld [vmem:[#allocation2 + $0x18c] sm:$0xf] }
  0x73   :  { %1426 = vmatpush.bf16.msrb.mxu2 %v2696_v15  ;;  %1471 = vmatpush.bf16.msra.mxu0 %v2428_v18  ;;  %v3104_v15 = vld [vmem:[#allocation2 + $0x354] sm:$0xf0]  ;;  %v2667_v56 = vld [vmem:[#allocation2 + $0x4c8] sm:$0xf]  ;;  %v2253_v41 = vld [vmem:[#allocation2 + $0x198] sm:$0xf0] }
  0x74   :  { %1446 = vmatpush.bf16.msrb.mxu1 %v2156_v21  ;;  %v3004_v18 = vld [vmem:[#allocation2 + $0x34] sm:$0xf0]  ;;  %v2348_v21 = vor.u32 %v3072_v13, %v2347_v11  ;;  %v2476_v22 = vor.u32 %v3104_v15, %v2475_v14  ;;  %v2651_v8 = vld [vmem:[#allocation2 + $0x4a8] sm:$0xf]  ;;  %v2160_v13 = vor.u32 %v3022_v4, %v2157_v5  ;;  %v3054_v14 = vld [vmem:[#allocation2 + $0x1cc] sm:$0xf] }
  0x75   :  { %v3184_v62 = vld [vmem:[#allocation2 + $0x5d4] sm:$0xf0]  ;;  %v2779_v11 = vld [vmem:[#allocation2 + $0x5a8] sm:$0xf]  ;;  %v2285_v15 = vld [vmem:[#allocation2 + $0x1d8] sm:$0xf0] }
  0x76   :  { %1459 = vmatpush.bf16.msrb.mxu3 %v2284_v25  ;;  %1427 = vmatmul.bf16.vlgmr.msrb.gmra.mxu2 %v3388_v35  ;;  %v2076_v25 = vor.u32 %v3004_v18, %v2075_v17  ;;  %v3018_v17 = vld [vmem:[#allocation2 + $0xac] sm:$0xf]  ;;  %v2141_v18 = vld [vmem:[#allocation2 + $0xb8] sm:$0xf0]  ;;  %v2763_v23 = vld [vmem:[#allocation2 + $0x588] sm:$0xf] }
  0x77   :  { %1484 = vmatpush.bf16.msra.mxu2 %v2556_v19  ;;  %1472 = vmatpush.bf16.msra.mxu0 %v2412_v31  ;;  %v2203_v19 = vld [vmem:[#allocation2 + $0x128] sm:$0xf]  ;;  %v3000_v31 = vld [vmem:[#allocation2 + $0x14] sm:$0xf0]  ;;  %v3038_v4 = vld [vmem:[#allocation2 + $0x14c] sm:$0xf] }
  0x78   :  { %1447 = vmatpush.bf16.msrb.mxu1 %v2140_v34  ;;  %v2204_v29 = vor.u32 %v3036_v20, %v2203_v19  ;;  %v2683_v34 = vld [vmem:[#allocation2 + $0x4e8] sm:$0xf]  ;;  %v2060_v43 = vor.u32 %v3000_v31, %v2059_v28  ;;  %v3176_v24 = vld [vmem:[#allocation2 + $0x594] sm:$0xf0]  ;;  %v2125_v31 = vld [vmem:[#allocation2 + $0x98] sm:$0xf0] }
  0x79   :  { %v2684_v49 = vor.u32 %v3156_v36, %v2683_v34  ;;  %v2635_v20 = vld [vmem:[#allocation2 + $0x488] sm:$0xf]  ;;  %v3140_v34 = vld [vmem:[#allocation2 + $0x474] sm:$0xf0]  ;;  %v2221_v5 = vld [vmem:[#allocation2 + $0x158] sm:$0xf0] }
  0x7a   :  { %1460 = vmatpush.bf16.msrb.mxu3 %v2268_v39  ;;  %v2460_v39 = vor.u32 %v3100_v27, %v2459_v26  ;;  %v3050_v26 = vld [vmem:[#allocation2 + $0x1ac] sm:$0xf]  ;;  %v2269_v27 = vld [vmem:[#allocation2 + $0x1b8] sm:$0xf0]  ;;  %v2747_v37 = vld [vmem:[#allocation2 + $0x568] sm:$0xf] }
  0x7b   :  { %1485 = vmatpush.bf16.msra.mxu2 %v2540_v32  ;;  %1473 = vmatpush.bf16.msra.mxu0 %v2396_v44  ;;  %v2187_v32 = vld [vmem:[#allocation2 + $0x108] sm:$0xf]  ;;  %v2272_v36 = vor.u32 %v3050_v26, %v2269_v27 }
  0x7c   :  { %1448 = vmatpush.bf16.msrb.mxu1 %v2124_v48  ;;  %v2443_v44 = vld [vmem:[#allocation2 + $0x308] sm:$0xf]  ;;  %v2188_v48 = vor.u32 %v3032_v33, %v2187_v32  ;;  %v2764_v32 = vor.u32 %v3176_v24, %v2763_v23  ;;  %v2998_v24 = vld [vmem:[#allocation2 + $0xc] sm:$0xf] }
  0x7d   :  { %v2619_v33 = vld [vmem:[#allocation2 + $0x468] sm:$0xf] }
  0x7e   :  { %1461 = vmatpush.bf16.msrb.mxu3 %v2252_v53  ;;  %2834 = vmatmul.msk.bf16.vlgmr.msrb.gmra.mxu0 %vm1259_vm0, %v3376_v45  ;;  %v3192_v53 = vld [vmem:[#allocation2 + $0x614] sm:$0xf0]  ;;  %v2620_v42 = vor.u32 %v3140_v34, %v2619_v33  ;;  %v3086_v33 = vld [vmem:[#allocation2 + $0x2cc] sm:$0xf]  ;;  %v2413_v34 = vld [vmem:[#allocation2 + $0x2d8] sm:$0xf0] }
  0x7f   :  { %1486 = vmatpush.bf16.msra.mxu2 %v2524_v46  ;;  %1474 = vmatpush.bf16.msra.mxu0 %v2380_v60  ;;  %v3096_v46 = vld [vmem:[#allocation2 + $0x314] sm:$0xf0]  ;;  %v2828_v0 = vor.u32 %v3192_v53, %v2827_v52 }
  0x80   :  { %1449 = vmatpush.bf16.msrb.mxu1 %v2108_v63  ;;  %v2444_v60 = vor.u32 %v3096_v46, %v2443_v44  ;;  %v2176_v63 = vor.u32 %v3026_v47, %v2173_v50  ;;  %v2109_v44 = vld [vmem:[#allocation2 + $0x78] sm:$0xf0]  ;;  %v2603_v47 = vld [vmem:[#allocation2 + $0x448] sm:$0xf]  ;;  %v3168_v52 = vld [vmem:[#allocation2 + $0x554] sm:$0xf0] }
  0x81   :  { %v2731_v50 = vld [vmem:[#allocation2 + $0x548] sm:$0xf] }
  0x82   :  { %1462 = vmatpush.bf16.msrb.mxu3 %v2236_v3  ;;  %v2668_v3 = vor.u32 %v3152_v58, %v2667_v56  ;;  %v2237_v56 = vld [vmem:[#allocation2 + $0x178] sm:$0xf0] }
  0x83   :  { %1487 = vmatpush.bf16.msra.mxu2 %v2508_v61  ;;  %1475 = vmatpush.bf16.msra.mxu0 %v2364_v9  ;;  %v2795_v61 = vld [vmem:[#allocation2 + $0x5c8] sm:$0xf]  ;;  %v3148_v9 = vld [vmem:[#allocation2 + $0x4b4] sm:$0xf0] }
  0x84   :  { %1450 = vmatpush.bf16.msrb.mxu1 %v2092_v12  ;;  %v2796_v6 = vor.u32 %v3184_v62, %v2795_v61  ;;  %v3180_v12 = vld [vmem:[#allocation2 + $0x5b4] sm:$0xf0]  ;;  %v2732_v61 = vor.u32 %v3168_v52, %v2731_v50  ;;  %v2587_v62 = vld [vmem:[#allocation2 + $0x428] sm:$0xf]  ;;  %v3082_v50 = vld [vmem:[#allocation2 + $0x2ac] sm:$0xf] }
  0x85   :  { %v2780_v19 = vor.u32 %v3180_v12, %v2779_v11  ;;  %v3128_v12 = vld [vmem:[#allocation2 + $0x414] sm:$0xf0]  ;;  %v2397_v52 = vld [vmem:[#allocation2 + $0x2b8] sm:$0xf0] }
  0x86   :  { %1463 = vmatpush.bf16.msrb.mxu3 %v2220_v16  ;;  %v2652_v16 = vor.u32 %v3148_v9, %v2651_v8  ;;  %v3002_v8 = vld [vmem:[#allocation2 + $0x2c] sm:$0xf]  ;;  %v2077_v9 = vld [vmem:[#allocation2 + $0x38] sm:$0xf0] }
  0x87   :  { %1488 = vmatpush.bf16.msra.mxu2 %v2492_v10  ;;  %1476 = vmatpush.bf16.msra.mxu0 %v2348_v21  ;;  %v2304_v10 = vor.u32 %v3058_v1, %v2301_v2  ;;  %v3144_v21 = vld [vmem:[#allocation2 + $0x494] sm:$0xf0]  ;;  %v2715_v1 = vld [vmem:[#allocation2 + $0x528] sm:$0xf] }
  0x88   :  { %1451 = vmatpush.bf16.msrb.mxu1 %v2076_v25  ;;  %v2144_v25 = vor.u32 %v3018_v17, %v2141_v18  ;;  %v2636_v28 = vor.u32 %v3144_v21, %v2635_v20  ;;  %v3164_v2 = vld [vmem:[#allocation2 + $0x534] sm:$0xf0]  ;;  %v2429_v17 = vld [vmem:[#allocation2 + $0x2f8] sm:$0xf0]  ;;  %v3122_v18 = vld [vmem:[#allocation2 + $0x3ec] sm:$0xf] }
  0x89   :  { %v2716_v11 = vor.u32 %v3164_v2, %v2715_v1  ;;  %v2557_v20 = vld [vmem:[#allocation2 + $0x3f8] sm:$0xf0]  ;;  %v3034_v21 = vld [vmem:[#allocation2 + $0x12c] sm:$0xf] }
  0x8a   :  { %1464 = vmatpush.bf16.msrb.mxu3 %v2204_v29  ;;  %v3014_v29 = vld [vmem:[#allocation2 + $0x8c] sm:$0xf]  ;;  %v2381_v2 = vld [vmem:[#allocation2 + $0x298] sm:$0xf0] }
  0x8b   :  { %1489 = vmatpush.bf16.msra.mxu2 %v2476_v22  ;;  %1477 = vmatpush.bf16.msra.mxu0 %v2332_v38  ;;  %v2288_v22 = vor.u32 %v3054_v14, %v2285_v15  ;;  %v3172_v38 = vld [vmem:[#allocation2 + $0x574] sm:$0xf0]  ;;  %v2224_v15 = vor.u32 %v3038_v4, %v2221_v5  ;;  %v3078_v1 = vld [vmem:[#allocation2 + $0x28c] sm:$0xf]  ;;  %v2509_v5 = vld [vmem:[#allocation2 + $0x398] sm:$0xf0] }
  0x8c   :  { %1452 = vmatpush.bf16.msrb.mxu1 %v2060_v43  ;;  %v3010_v43 = vld [vmem:[#allocation2 + $0x6c] sm:$0xf]  ;;  %v2748_v46 = vor.u32 %v3172_v38, %v2747_v37  ;;  %v3160_v14 = vld [vmem:[#allocation2 + $0x514] sm:$0xf0]  ;;  %v2541_v38 = vld [vmem:[#allocation2 + $0x3d8] sm:$0xf0] }
  0x8d   :  { %v2112_v53 = vor.u32 %v3010_v43, %v2109_v44  ;;  %v2813_v43 = vld [vmem:[#allocation2 + $0x5f8] sm:$0xf0]  ;;  %v2416_v44 = vor.u32 %v3086_v33, %v2413_v34  ;;  %v3110_v4 = vld [vmem:[#allocation2 + $0x38c] sm:$0xf] }
  0x8e   :  { %1465 = vmatpush.bf16.msrb.mxu3 %v2188_v48  ;;  %v3136_v48 = vld [vmem:[#allocation2 + $0x454] sm:$0xf0]  ;;  %v3170_v33 = vld [vmem:[#allocation2 + $0x56c] sm:$0xf]  ;;  %v2749_v34 = vld [vmem:[#allocation2 + $0x578] sm:$0xf0] }
  0x8f   :  { %1490 = vmatpush.bf16.msra.mxu2 %v2460_v39  ;;  %1478 = vmatpush.bf16.msra.mxu0 %v2316_v59  ;;  %v2128_v39 = vor.u32 %v3014_v29, %v2125_v31  ;;  %v2604_v58 = vor.u32 %v3136_v48, %v2603_v47  ;;  %v3006_v59 = vld [vmem:[#allocation2 + $0x4c] sm:$0xf]  ;;  %v2685_v29 = vld [vmem:[#allocation2 + $0x4f8] sm:$0xf0]  ;;  %v2560_v31 = vor.u32 %v3122_v18, %v2557_v20 }
  0x90   :  { %1497 = vmatpush.bf16.msra.mxu1 %v2684_v49  ;;  %v2256_v49 = vor.u32 %v3046_v40, %v2253_v41  ;;  %v2189_v40 = vld [vmem:[#allocation2 + $0x118] sm:$0xf0]  ;;  %v3174_v20 = vld [vmem:[#allocation2 + $0x58c] sm:$0xf] }
  0x91   :  { %1466 = vmatmul.bf16.vlgmr.msrb.gmra.mxu3 %v3369_v7  ;;  %1453 = vmatmul.bf16.vlgmr.msrb.gmra.mxu1 %v3360_v55  ;;  %v2669_v47 = vld [vmem:[#allocation2 + $0x4d8] sm:$0xf0] }
  0x92   :  { %1510 = vmatpush.bf16.msra.mxu3 %v2812_v54  ;;  %1479 = vmatmul.bf16.vlgmr.msra.gmra.mxu0 %v3358_v51  ;;  %v3042_v54 = vld [vmem:[#allocation2 + $0x16c] sm:$0xf]  ;;  %v2493_v18 = vld [vmem:[#allocation2 + $0x378] sm:$0xf0] }
  0x93   :  { %1491 = vmatpush.bf16.msra.mxu2 %v2444_v60  ;;  %1530 = vmatpush.bf16.msrb.mxu0 %v2828_v0  ;;  %v2093_v60 = vld [vmem:[#allocation2 + $0x58] sm:$0xf0]  ;;  %v2240_v0 = vor.u32 %v3042_v54, %v2237_v56  ;;  %v3114_v54 = vld [vmem:[#allocation2 + $0x3ac] sm:$0xf] }
  0x94   :  { %1498 = vmatpush.bf16.msra.mxu1 %v2668_v3  ;;  %v2096_v3 = vor.u32 %v3006_v59, %v2093_v60  ;;  %v2525_v56 = vld [vmem:[#allocation2 + $0x3b8] sm:$0xf0]  ;;  %v3182_v59 = vld [vmem:[#allocation2 + $0x5cc] sm:$0xf] }
  0x95   :  { %v2797_v60 = vld [vmem:[#allocation2 + $0x5d8] sm:$0xf0] }
  0x96   :  { %1511 = vmatpush.bf16.msra.mxu3 %v2796_v6  ;;  %1492 = vmatmul.bf16.vlgmr.msra.gmra.mxu2 %v3362_v57 }
  0x97   :  { %1536 = vmatpush.bf16.msrb.mxu2 %v2176_v63  ;;  %1549 = vmatpush.bf16.msra.mxu0 %v2304_v10  ;;  %v3132_v63 = vld [vmem:[#allocation2 + $0x434] sm:$0xf0]  ;;  %v2571_v10 = vld [vmem:[#allocation2 + $0x408] sm:$0xf] }
  0x98   :  { %1499 = vmatpush.bf16.msra.mxu1 %v2652_v16  ;;  %v2588_v6 = vor.u32 %v3132_v63, %v2587_v62  ;;  %v3090_v16 = vld [vmem:[#allocation2 + $0x2ec] sm:$0xf]  ;;  %v2572_v23 = vor.u32 %v3128_v12, %v2571_v10  ;;  %v2653_v63 = vld [vmem:[#allocation2 + $0x4b8] sm:$0xf0]  ;;  %v2384_v10 = vor.u32 %v3078_v1, %v2381_v2 }
  0x99   :  { %v2432_v27 = vor.u32 %v3090_v16, %v2429_v17  ;;  %v3146_v62 = vld [vmem:[#allocation2 + $0x4ac] sm:$0xf]  ;;  %v2637_v12 = vld [vmem:[#allocation2 + $0x498] sm:$0xf0] }
  0x9a   :  { %1512 = vmatpush.bf16.msra.mxu3 %v2780_v19  ;;  %v2080_v19 = vor.u32 %v3002_v8, %v2077_v9  ;;  %v3178_v8 = vld [vmem:[#allocation2 + $0x5ac] sm:$0xf]  ;;  %v2781_v9 = vld [vmem:[#allocation2 + $0x5b8] sm:$0xf0] }
  0x9b   :  { %1537 = vmatpush.bf16.msrb.mxu2 %v2160_v13  ;;  %1550 = vmatpush.bf16.msra.mxu0 %v2288_v22  ;;  %v2699_v13 = vld [vmem:[#allocation2 + $0x508] sm:$0xf]  ;;  %v2205_v22 = vld [vmem:[#allocation2 + $0x138] sm:$0xf0]  ;;  %v2784_v16 = vor.u32 %v3178_v8, %v2781_v9  ;;  %v3106_v17 = vld [vmem:[#allocation2 + $0x36c] sm:$0xf] }
  0x9c   :  { %1500 = vmatpush.bf16.msra.mxu1 %v2636_v28  ;;  %v2700_v26 = vor.u32 %v3160_v14, %v2699_v13  ;;  %v3154_v28 = vld [vmem:[#allocation2 + $0x4ec] sm:$0xf]  ;;  %v2512_v13 = vor.u32 %v3110_v4, %v2509_v5  ;;  %v2829_v2 = vld [vmem:[#allocation2 + $0x618] sm:$0xf0] }
  0x9d   :  { %v2688_v41 = vor.u32 %v3154_v28, %v2685_v29  ;;  %v3074_v14 = vld [vmem:[#allocation2 + $0x26c] sm:$0xf] }
  0x9e   :  { %1513 = vmatpush.bf16.msra.mxu3 %v2764_v32  ;;  %v2208_v32 = vor.u32 %v3034_v21, %v2205_v22  ;;  %v2765_v21 = vld [vmem:[#allocation2 + $0x598] sm:$0xf0]  ;;  %v3102_v29 = vld [vmem:[#allocation2 + $0x34c] sm:$0xf] }
  0x9f   :  { %1538 = vmatpush.bf16.msrb.mxu2 %v2144_v25  ;;  %1551 = vmatpush.bf16.msra.mxu0 %v2272_v36  ;;  %v2061_v25 = vld [vmem:[#allocation2 + $0x18] sm:$0xf0]  ;;  %v3118_v36 = vld [vmem:[#allocation2 + $0x3cc] sm:$0xf] }
  0xa0   :  { %1501 = vmatpush.bf16.msra.mxu1 %v2620_v42  ;;  %v2064_v37 = vor.u32 %v2998_v24, %v2061_v25  ;;  %v3186_v42 = vld [vmem:[#allocation2 + $0x5ec] sm:$0xf]  ;;  %v2544_v48 = vor.u32 %v3118_v36, %v2541_v38  ;;  %v2621_v24 = vld [vmem:[#allocation2 + $0x478] sm:$0xf0] }
  0xa1   :  { %v3070_v25 = vld [vmem:[#allocation2 + $0x24c] sm:$0xf] }
  0xa2   :  { %1514 = vmatpush.bf16.msra.mxu3 %v2748_v46  ;;  %2835 = vmatmul.msk.bf16.vlgmr.msrb.gmra.mxu0 %vm1259_vm0, %v3376_v45  ;;  %v3150_v46 = vld [vmem:[#allocation2 + $0x4cc] sm:$0xf] }
  0xa3   :  { %1539 = vmatpush.bf16.msrb.mxu2 %v2128_v39  ;;  %1552 = vmatpush.bf16.msra.mxu0 %v2256_v49  ;;  %v3030_v39 = vld [vmem:[#allocation2 + $0x10c] sm:$0xf] }
  0xa4   :  { %1502 = vmatpush.bf16.msra.mxu1 %v2604_v58  ;;  %v2192_v49 = vor.u32 %v3030_v39, %v2189_v40  ;;  %v2672_v58 = vor.u32 %v3150_v46, %v2669_v47  ;;  %v3134_v38 = vld [vmem:[#allocation2 + $0x44c] sm:$0xf]  ;;  %v2605_v39 = vld [vmem:[#allocation2 + $0x458] sm:$0xf0] }
  0xa5   :  { %v3098_v46 = vld [vmem:[#allocation2 + $0x32c] sm:$0xf]  ;;  %v2461_v47 = vld [vmem:[#allocation2 + $0x338] sm:$0xf0] }
  0xa6   :  { %1515 = vmatpush.bf16.msra.mxu3 %v2732_v61  ;;  %v2400_v61 = vor.u32 %v3082_v50, %v2397_v52  ;;  %v3166_v50 = vld [vmem:[#allocation2 + $0x54c] sm:$0xf]  ;;  %v2733_v52 = vld [vmem:[#allocation2 + $0x558] sm:$0xf0] }
  0xa7   :  { %1540 = vmatpush.bf16.msrb.mxu2 %v2112_v53  ;;  %1553 = vmatpush.bf16.msra.mxu0 %v2240_v0  ;;  %v2816_v53 = vor.u32 %v3186_v42, %v2813_v43  ;;  %v2528_v0 = vor.u32 %v3114_v54, %v2525_v56  ;;  %v3066_v42 = vld [vmem:[#allocation2 + $0x22c] sm:$0xf]  ;;  %v2333_v43 = vld [vmem:[#allocation2 + $0x238] sm:$0xf0] }
  0xa8   :  { %1503 = vmatpush.bf16.msra.mxu1 %v2588_v6  ;;  %v2656_v6 = vor.u32 %v3146_v62, %v2653_v63  ;;  %v2336_v54 = vor.u32 %v3066_v42, %v2333_v43  ;;  %v3130_v56 = vld [vmem:[#allocation2 + $0x42c] sm:$0xf]  ;;  %v2736_v63 = vor.u32 %v3166_v50, %v2733_v52 }
  0xa9   :  { %v3094_v62 = vld [vmem:[#allocation2 + $0x30c] sm:$0xf] }
  0xaa   :  { %1516 = vmatpush.bf16.msra.mxu3 %v2716_v11  ;;  %v3142_v11 = vld [vmem:[#allocation2 + $0x48c] sm:$0xf] }
  0xab   :  { %1541 = vmatpush.bf16.msrb.mxu2 %v2096_v3  ;;  %1554 = vmatpush.bf16.msra.mxu0 %v2224_v15  ;;  %v2800_v3 = vor.u32 %v3182_v59, %v2797_v60  ;;  %v2365_v15 = vld [vmem:[#allocation2 + $0x278] sm:$0xf0]  ;;  %v2464_v59 = vor.u32 %v3098_v46, %v2461_v47  ;;  %v3062_v60 = vld [vmem:[#allocation2 + $0x20c] sm:$0xf]  ;;  %v3193_v46 = vld [vmem:[%s3545_s3] sm:$0xff] }
  0xac   :  { %1504 = vmatpush.bf16.msra.mxu1 %v2572_v23  ;;  %v2368_v22 = vor.u32 %v3074_v14, %v2365_v15  ;;  %v3138_v23 = vld [vmem:[#allocation2 + $0x46c] sm:$0xf]  ;;  %v3412_v28 = vpop.f32.mrf.mxu1 }
  0xad   :  { %v3190_v1 = vld [vmem:[#allocation2 + $0x60c] sm:$0xf] }
  0xae   :  { %1517 = vmatpush.bf16.msra.mxu3 %v2700_v26  ;;  %v2349_v26 = vld [vmem:[#allocation2 + $0x258] sm:$0xf0]  ;;  %v3162_v5 = vld [vmem:[#allocation2 + $0x52c] sm:$0xf]  ;;  %v2832_v14 = vor.u32 %v3190_v1, %v2829_v2 }
  0xaf   :  { %1542 = vmatpush.bf16.msrb.mxu2 %v2080_v19  ;;  %1555 = vmatpush.bf16.msra.mxu0 %v2208_v32  ;;  %v3410_v19 = vpop.f32.mrf.mxu0  ;;  %v2624_v32 = vor.u32 %v3138_v23, %v2621_v24  ;;  %v3199_v23 = vld [vmem:[%s3545_s3 + $0x30] sm:$0xff]  ;;  %v3194_v43 = vld [vmem:[%s3545_s3 + $0x8] sm:$0xff]  ;;  %v3216_v1 = vld [vmem:[%s3545_s3 + $0xb8] sm:$0xff] }
  0xb0   :  { %1562 = vmatpush.bf16.msrb.mxu1 %v2432_v27  ;;  %v2768_v27 = vor.u32 %v3174_v20, %v2765_v21  ;;  %v2701_v20 = vld [vmem:[#allocation2 + $0x518] sm:$0xf0] }
  0xb1   :  { %1505 = vmatmul.bf16.vlgmr.msra.gmra.mxu1 %v3386_v30  ;;  %1518 = vmatmul.bf16.vlgmr.msra.gmra.mxu3 %v3388_v35  ;;  %v3208_v21 = vld [vmem:[%s3545_s3 + $0x78] sm:$0xff] }
  0xb2   :  { %1575 = vmatpush.bf16.msrb.mxu3 %v2560_v31  ;;  %v2477_v31 = vld [vmem:[#allocation2 + $0x358] sm:$0xf0] }
  0xb3   :  { %1543 = vmatpush.bf16.msrb.mxu2 %v2064_v37  ;;  %1556 = vmatpush.bf16.msra.mxu0 %v2192_v49  ;;  %v2352_v37 = vor.u32 %v3070_v25, %v2349_v26  ;;  %v2480_v40 = vor.u32 %v3102_v29, %v2477_v31  ;;  %v2608_v49 = vor.u32 %v3134_v38, %v2605_v39  ;;  %v3198_v26 = vld [vmem:[%s3545_s3 + $0x28] sm:$0xff]  ;;  %v3205_v31 = vld [vmem:[%s3545_s3 + $0x60] sm:$0xff] }
  0xb4   :  { %1563 = vmatpush.bf16.msrb.mxu1 %v2416_v44  ;;  %v3414_v36 = vpop.f32.mrf.mxu2  ;;  %v2752_v44 = vor.u32 %v3170_v33, %v2749_v34  ;;  %v3204_v34 = vld [vmem:[%s3545_s3 + $0x58] sm:$0xff] }
  0xb6   :  { %1576 = vmatpush.bf16.msrb.mxu3 %v2544_v48  ;;  %1544 = vmatmul.bf16.vlgmr.msrb.gmra.mxu2 %v3360_v55  ;;  %v2640_v55 = vor.u32 %v3142_v11, %v2637_v12  ;;  %v2573_v11 = vld [vmem:[#allocation2 + $0x418] sm:$0xf0] }
  0xb7   :  { %1588 = vmatpush.bf16.msra.mxu2 %v2688_v41  ;;  %1601 = vmatpush.bf16.msrb.mxu0 %v2816_v53  ;;  %v3416_v41 = vpop.f32.mrf.mxu3  ;;  %v1274_v48 = vpop.f32.mrf.mxu0  ;;  %v3421_v53 = vld [vmem:[%s3544_s2] sm:$0xf] }
  0xb8   :  { %1564 = vmatpush.bf16.msrb.mxu1 %v2400_v61  ;;  %1557 = vmatmul.bf16.vlgmr.msra.gmra.mxu0 %v3369_v7  ;;  %v2496_v7 = vor.u32 %v3106_v17, %v2493_v18  ;;  %v2317_v61 = vld [vmem:[#allocation2 + $0x218] sm:$0xf0]  ;;  %v271_v12 = vperm.slane %v3421_v53, 0  ;;  %v272_v52 = vperm.slane %v3421_v53, 1 }
  0xb9   :  { %v2320_v9 = vor.u32 %v3062_v60, %v2317_v61 }
  0xba   :  { %1577 = vmatpush.bf16.msrb.mxu3 %v2528_v0  ;;  %v2445_v0 = vld [vmem:[#allocation2 + $0x318] sm:$0xf0] }
  0xbb   :  { %1589 = vmatpush.bf16.msra.mxu2 %v2672_v58  ;;  %1602 = vmatpush.bf16.msrb.mxu0 %v2800_v3  ;;  %v2589_v58 = vld [vmem:[#allocation2 + $0x438] sm:$0xf0]  ;;  %v1287_v3 = vpop.f32.mrf.mxu1 }
  0xbc   :  { %1565 = vmatpush.bf16.msrb.mxu1 %v2384_v10  ;;  %v2592_v4 = vor.u32 %v3130_v56, %v2589_v58  ;;  %v1300_v8 = vpop.f32.mrf.mxu2  ;;  %v3126_v10 = vld [vmem:[#allocation2 + $0x40c] sm:$0xf] }
  0xbd   :  { %v2576_v18 = vor.u32 %v3126_v10, %v2573_v11  ;;  %v3214_v8 = vld [vmem:[%s3545_s3 + $0xa8] sm:$0xff] }
  0xbe   :  { %1578 = vmatpush.bf16.msrb.mxu3 %v2512_v13  ;;  %v2448_v13 = vor.u32 %v3094_v62, %v2445_v0 }
  0xbf   :  { %1590 = vmatpush.bf16.msra.mxu2 %v2656_v6  ;;  %1603 = vmatpush.bf16.msrb.mxu0 %v2784_v16  ;;  %v2717_v6 = vld [vmem:[#allocation2 + $0x538] sm:$0xf0]  ;;  %v1313_v15 = vpop.f32.mrf.mxu3 }
  0xc0   :  { %1566 = vmatpush.bf16.msrb.mxu1 %v2368_v22  ;;  %v3200_v16 = vld [vmem:[%s3545_s3 + $0x38] sm:$0xff]  ;;  %v2720_v17 = vor.u32 %v3162_v5, %v2717_v6  ;;  %v1273_v22 = vadd.f32 %v3410_v19, %v271_v12  ;;  %v3207_v19 = vld [vmem:[%s3545_s3 + $0x70] sm:$0xff] }
  0xc2   :  { %1579 = vmatpush.bf16.msrb.mxu3 %v2496_v7  ;;  %v1286_v25 = vadd.f32 %v3412_v28, %v1273_v22 }
  0xc3   :  { %1591 = vmatpush.bf16.msra.mxu2 %v2640_v55  ;;  %1604 = vmatpush.bf16.msrb.mxu0 %v2768_v27  ;;  %v3158_v55 = vld [vmem:[#allocation2 + $0x50c] sm:$0xf]  ;;  %v3197_v27 = vld [vmem:[%s3545_s3 + $0x20] sm:$0xff] }
  0xc4   :  { %1567 = vmatpush.bf16.msrb.mxu1 %v2352_v37  ;;  %v2704_v24 = vor.u32 %v3158_v55, %v2701_v20  ;;  %v1350_v7 = vpop.f32.mrf.mxu2 }
  0xc6   :  { %1580 = vmatpush.bf16.msrb.mxu3 %v2480_v40 }
  0xc7   :  { %1592 = vmatpush.bf16.msra.mxu2 %v2624_v32  ;;  %1605 = vmatpush.bf16.msrb.mxu0 %v2752_v44 }
  0xc8   :  { %1568 = vmatpush.bf16.msrb.mxu1 %v2336_v54 }
  0xca   :  { %1581 = vmatpush.bf16.msrb.mxu3 %v2464_v59 }
  0xcb   :  { %1593 = vmatpush.bf16.msra.mxu2 %v2608_v49  ;;  %1606 = vmatpush.bf16.msrb.mxu0 %v2736_v63  ;;  %v3201_v49 = vld [vmem:[%s3545_s3 + $0x40] sm:$0xff] }
  0xcc   :  { %1569 = vmatpush.bf16.msrb.mxu1 %v2320_v9  ;;  %v1352_v29 = vpop.f32.mrf.mxu2 }
  0xce   :  { %1582 = vmatpush.bf16.msrb.mxu3 %v2448_v13  ;;  %v1337_v28 = vpop.f32.mrf.mxu1  ;;  %v3213_v13 = vld [vmem:[%s3545_s3 + $0xa0] sm:$0xff] }
  0xcf   :  { %1594 = vmatpush.bf16.msra.mxu2 %v2592_v4  ;;  %1607 = vmatpush.bf16.msrb.mxu0 %v2720_v17  ;;  %v3215_v4 = vld [vmem:[%s3545_s3 + $0xb0] sm:$0xff]  ;;  %v3212_v17 = vld [vmem:[%s3545_s3 + $0x98] sm:$0xff] }
  0xd0   :  { %1621 = vmatpush.bf16.msra.mxu1 %v2832_v14 }
  0xd1   :  { %1570 = vmatmul.bf16.vlgmr.msrb.gmra.mxu1 %v3358_v51  ;;  %1583 = vmatmul.bf16.vlgmr.msrb.gmra.mxu3 %v3362_v57  ;;  %v3206_v51 = vld [vmem:[%s3545_s3 + $0x68] sm:$0xff]  ;;  %v1299_v57 = vadd.f32 %v3414_v36, %v1286_v25  ;;  %v3195_v36 = vld [vmem:[%s3545_s3 + $0x10] sm:$0xff]  ;;  %v3224_v25 = vld [vmem:[%s3545_s3 + $0xf8] sm:$0xff] }
  0xd2   :  { %1895 = vmatpush.bf16.msra.mxu3 %v3200_v16 }
  0xd3   :  { %1595 = vmatpush.bf16.msra.mxu2 %v2576_v18  ;;  %1608 = vmatpush.bf16.msrb.mxu0 %v2704_v24  ;;  %v1312_v32 = vadd.f32 %v3416_v41, %v1299_v57  ;;  %v3203_v41 = vld [vmem:[%s3545_s3 + $0x50] sm:$0xff]  ;;  %v273_v57 = vperm.slane %v3421_v53, 2 }
  0xd4   :  { %1908 = vmatpush.bf16.msrb.mxu1 %v3208_v21  ;;  %v1363_v39 = vpop.f32.mrf.mxu3  ;;  %v3211_v18 = vld [vmem:[%s3545_s3 + $0x90] sm:$0xff]  ;;  %v3210_v21 = vld [vmem:[%s3545_s3 + $0x88] sm:$0xff] }
  0xd5   :  { %v1364_v56 = vadd.f32 %v1363_v39, %v272_v52  ;;  %v3217_v52 = vld [vmem:[%s3545_s3 + $0xc0] sm:$0xff] }
  0xd6   :  { %1896 = vmatpush.bf16.msra.mxu3 %v3199_v23  ;;  %1596 = vmatmul.bf16.vlgmr.msra.gmra.mxu2 %v3386_v30  ;;  %v1324_v30 = vpop.f32.mrf.mxu0  ;;  %v1339_v40 = vpop.f32.mrf.mxu1  ;;  %v3209_v23 = vld [vmem:[%s3545_s3 + $0x80] sm:$0xff] }
  0xd7   :  { %1609 = vmatmul.bf16.vlgmr.msrb.gmra.mxu0 %v3388_v35  ;;  %v3196_v35 = vld [vmem:[%s3545_s3 + $0x18] sm:$0xff]  ;;  %v1325_v33 = vadd.f32 %v1324_v30, %v1312_v32  ;;  %1921 = vmatpush.bf16.msrb.mxu2 %v3216_v1 }
  0xd8   :  { %1909 = vmatpush.bf16.msrb.mxu1 %v3207_v19  ;;  %1934 = vmatpush.bf16.msra.mxu0 %v3224_v25 }
  0xd9   :  { %v1338_v37 = vadd.f32 %v1337_v28, %v1325_v33  ;;  %v1376_v42 = vpop.f32.mrf.mxu2 }
  0xda   :  { %1897 = vmatpush.bf16.msra.mxu3 %v3198_v26  ;;  %v1377_v58 = vadd.f32 %v1376_v42, %v1364_v56  ;;  %v3223_v26 = vld [vmem:[%s3545_s3 + $0xf0] sm:$0xff]  ;;  %v274_v56 = vperm.slane %v3421_v53, 3 }
  0xdb   :  { %v1351_v44 = vadd.f32 %v1350_v7, %v1338_v37  ;;  %1922 = vmatpush.bf16.msrb.mxu2 %v3215_v4  ;;  %v3220_v37 = vld [vmem:[%s3545_s3 + $0xd8] sm:$0xff] }
  0xdc   :  { %1910 = vmatpush.bf16.msrb.mxu1 %v3206_v51  ;;  %v1365_v48 = vpop.f32.mrf.mxu3  ;;  %1935 = vmatpush.bf16.msra.mxu0 %v3223_v26  ;;  %v3225_v26 = vld [vmem:[#allocation4] sm:$0xff] }
  0xdd   :  { %v1627_v47 = vmax.f32 %v1351_v44, 0.0 }
  0xde   :  { %1898 = vmatpush.bf16.msra.mxu3 %v3197_v27  ;;  %v1326_v38 = vpop.f32.mrf.mxu0 }
  0xdf   :  { %v1631_v54 = vpack.c.bf16 %v1627_v47, %v1627_v47  ;;  %1923 = vmatpush.bf16.msrb.mxu2 %v3214_v8  ;;  %v3218_v47 = vld [vmem:[%s3545_s3 + $0xc8] sm:$0xff] }
  0xe0   :  { %1911 = vmatpush.bf16.msrb.mxu1 %v3205_v31  ;;  %v3222_v31 = vld [vmem:[%s3545_s3 + $0xe8] sm:$0xff] }
  0xe1   :  { %2836 = vmatmul.msk.bf16.vlgmr.msra.gmra.mxu1 %vm1259_vm0, %v3376_v45  ;;  %v3202_v45 = vld [vmem:[%s3545_s3 + $0x48] sm:$0xff]  ;;  %v1378_v50 = vpop.f32.mrf.mxu2  ;;  %1936 = vmatpush.bf16.msra.mxu0 %v3222_v31 }
  0xe2   :  { %1899 = vmatpush.bf16.msra.mxu3 %v3196_v35  ;;  %v3221_v35 = vld [vmem:[%s3545_s3 + $0xe0] sm:$0xff] }
  0xe3   :  { %1924 = vmatpush.bf16.msrb.mxu2 %v3213_v13 }
  0xe4   :  { %1912 = vmatpush.bf16.msrb.mxu1 %v3204_v34 }
  0xe5   :  { %1937 = vmatpush.bf16.msra.mxu0 %v3221_v35 }
  0xe6   :  { %1900 = vmatpush.bf16.msra.mxu3 %v3195_v36 }
  0xe7   :  { %1925 = vmatpush.bf16.msrb.mxu2 %v3212_v17 }
  0xe8   :  { %1913 = vmatpush.bf16.msrb.mxu1 %v3203_v41  ;;  %v3219_v41 = vld [vmem:[%s3545_s3 + $0xd0] sm:$0xff] }
  0xe9   :  { %1938 = vmatpush.bf16.msra.mxu0 %v3220_v37 }
  0xea   :  { %1901 = vmatpush.bf16.msra.mxu3 %v3194_v43 }
  0xeb   :  { %v1389_v59 = vpop.f32.mrf.mxu0  ;;  %1926 = vmatpush.bf16.msrb.mxu2 %v3211_v18 }
  0xec   :  { %1914 = vmatpush.bf16.msrb.mxu1 %v3202_v45  ;;  %v1390_v60 = vadd.f32 %v1389_v59, %v1377_v58 }
  0xed   :  { %1939 = vmatpush.bf16.msra.mxu0 %v3219_v41 }
  0xee   :  { %1902 = vmatpush.bf16.msra.mxu3 %v3193_v46  ;;  %v1402_v61 = vpop.f32.mrf.mxu1 }
  0xef   :  { %v1403_v62 = vadd.f32 %v1402_v61, %v1390_v60  ;;  %1927 = vmatpush.bf16.msrb.mxu2 %v3210_v21  ;;  %v3231_v21 = vld [vmem:[#allocation4 + $0x30] sm:$0xff] }
  0xf0   :  { %1915 = vmatpush.bf16.msrb.mxu1 %v3201_v49 }
  0xf1   :  { %1903 = vmatmul.bf16.vlgmr.msra.gmra.mxu3 %v1631_v54  ;;  %1940 = vmatpush.bf16.msra.mxu0 %v3218_v47 }
  0xf3   :  { %v1391_v63 = vpop.f32.mrf.mxu0  ;;  %1928 = vmatpush.bf16.msrb.mxu2 %v3209_v23  ;;  %v3229_v23 = vld [vmem:[#allocation4 + $0x20] sm:$0xff] }
  0xf4   :  { %v1415_v0 = vpop.f32.mrf.mxu3 }
  0xf5   :  { %v1416_v2 = vadd.f32 %v1415_v0, %v1403_v62  ;;  %1941 = vmatpush.bf16.msra.mxu0 %v3217_v52 }
  0xf6   :  { %v1404_v5 = vpop.f32.mrf.mxu1 }
  0xf9   :  { %v1428_v3 = vpop.f32.mrf.mxu2 }
  0xfa   :  { %v1429_v6 = vadd.f32 %v1428_v3, %v1416_v2 }
  0xfb   :  { %v1441_v9 = vpop.f32.mrf.mxu0 }
  0xfc   :  { %v1417_v10 = vpop.f32.mrf.mxu3  ;;  %v1442_v11 = vadd.f32 %v1441_v9, %v1429_v6 }
  0xfe   :  { %v1628_v14 = vmax.f32 %v1442_v11, 0.0 }
 0x100   :  { %v1632_v15 = vpack.c.bf16 %v1628_v14, %v1628_v14 }
 0x101   :  { %v1430_v12 = vpop.f32.mrf.mxu2 }
 0x102   :  { %1916 = vmatmul.bf16.vlgmr.msrb.gmra.mxu1 %v1632_v15  ;;  %v3239_v15 = vld [vmem:[%s3546_s4] ss:$0 sm:$0xff] }
 0x103   :  { %v1443_v16 = vpop.f32.mrf.mxu0 }
 0x10e   :  { %v1454_v20 = vpop.f32.mrf.mxu1 }
 0x10f   :  { %v1480_v55 = vpop.f32.mrf.mxu0  ;;  %v1455_v28 = vadd.f32 %v1454_v20, %v273_v57  ;;  %v3232_v20 = vld [vmem:[#allocation4 + $0x38] sm:$0xff] }
 0x110   :  { %2017 = vmatpush.bf16.msrb.mxu3 %v3232_v20 }
 0x114   :  { %v1467_v22 = vpop.f32.mrf.mxu3  ;;  %2018 = vmatpush.bf16.msrb.mxu3 %v3231_v21 }
 0x115   :  { %v1468_v29 = vadd.f32 %v1467_v22, %v1455_v28  ;;  %v3230_v22 = vld [vmem:[#allocation4 + $0x28] sm:$0xff] }
 0x116   :  { %v1456_v19 = vpop.f32.mrf.mxu1 }
 0x117   :  { %v1482_v24 = vpop.f32.mrf.mxu0  ;;  %v1481_v33 = vadd.f32 %v1480_v55, %v1468_v29  ;;  %v3226_v19 = vld [vmem:[#allocation4 + $0x8] sm:$0xff] }
 0x118   :  { %2019 = vmatpush.bf16.msrb.mxu3 %v3230_v22  ;;  %v3228_v24 = vld [vmem:[#allocation4 + $0x18] sm:$0xff] }
 0x119   :  { %v1493_v7 = vpop.f32.mrf.mxu2 }
 0x11a   :  { %v1494_v36 = vadd.f32 %v1493_v7, %v1481_v33  ;;  %v3227_v7 = vld [vmem:[#allocation4 + $0x10] sm:$0xff] }
 0x11c   :  { %v1469_v51 = vpop.f32.mrf.mxu3  ;;  %2020 = vmatpush.bf16.msrb.mxu3 %v3229_v23 }
 0x11f   :  { %v1532_v27 = vpop.f32.mrf.mxu0 }
 0x120   :  { %2021 = vmatpush.bf16.msrb.mxu3 %v3228_v24 }
 0x121   :  { %v1495_v30 = vpop.f32.mrf.mxu2 }
 0x124   :  { %2022 = vmatpush.bf16.msrb.mxu3 %v3227_v7 }
 0x127   :  { %v1534_v32 = vpop.f32.mrf.mxu0 }
 0x128   :  { %2023 = vmatpush.bf16.msrb.mxu3 %v3226_v19  ;;  %v3240_v32 = vld [vmem:[%s3548_s6] ss:$0 sm:$0xff] }
 0x12c   :  { %2024 = vmatpush.bf16.msrb.mxu3 %v3225_v26 }
 0x12e   :  { %v1506_v34 = vpop.f32.mrf.mxu1 }
 0x12f   :  { %v1507_v38 = vadd.f32 %v1506_v34, %v1494_v36 }
 0x134   :  { %v1519_v40 = vpop.f32.mrf.mxu3 }
 0x135   :  { %v1558_v39 = vpop.f32.mrf.mxu0  ;;  %v1520_v42 = vadd.f32 %v1519_v40, %v1507_v38 }
 0x136   :  { %v1508_v43 = vpop.f32.mrf.mxu1 }
 0x137   :  { %v1533_v44 = vadd.f32 %v1532_v27, %v1520_v42 }
 0x139   :  { %v1545_v45 = vpop.f32.mrf.mxu2  ;;  %v1629_v46 = vmax.f32 %v1533_v44, 0.0 }
 0x13a   :  { %v1546_v58 = vadd.f32 %v1545_v45, %v274_v56 }
 0x13b   :  { %v1633_v48 = vpack.c.bf16 %v1629_v46, %v1629_v46 }
 0x13c   :  { %v1521_v50 = vpop.f32.mrf.mxu3  ;;  %v1559_v60 = vadd.f32 %v1558_v39, %v1546_v58 }
 0x13d   :  { %v1560_v49 = vpop.f32.mrf.mxu0  ;;  %1929 = vmatmul.bf16.vlgmr.msrb.gmra.mxu2 %v1633_v48 }
 0x141   :  { %v1547_v54 = vpop.f32.mrf.mxu2 }
 0x14e   :  { %v1571_v59 = vpop.f32.mrf.mxu1 }
 0x14f   :  { %v1572_v61 = vadd.f32 %v1571_v59, %v1559_v60 }
 0x154   :  { %v1584_v62 = vpop.f32.mrf.mxu3  ;;  %v1610_v63 = vpop.f32.mrf.mxu0 }
 0x155   :  { %v1585_v0 = vadd.f32 %v1584_v62, %v1572_v61 }
 0x156   :  { %v1573_v1 = vpop.f32.mrf.mxu1 }
 0x159   :  { %v1597_v2 = vpop.f32.mrf.mxu2 }
 0x15a   :  { %v1598_v3 = vadd.f32 %v1597_v2, %v1585_v0 }
 0x15c   :  { %v1586_v4 = vpop.f32.mrf.mxu3  ;;  %v1612_v5 = vpop.f32.mrf.mxu0  ;;  %v1611_v6 = vadd.f32 %v1610_v63, %v1598_v3 }
 0x15e   :  { %v1623_v8 = vpop.f32.mrf.mxu1 }
 0x15f   :  { %v1624_v9 = vadd.f32 %v1623_v8, %v1611_v6 }
 0x161   :  { %v1599_v10 = vpop.f32.mrf.mxu2  ;;  %v1630_v11 = vmax.f32 %v1624_v9, 0.0 }
 0x163   :  { %v1634_v12 = vpack.c.bf16 %v1630_v11, %v1630_v11 }
 0x165   :  { %1942 = vmatmul.bf16.vlgmr.msra.gmra.mxu0 %v1634_v12 }
 0x166   :  { %v1625_v53 = vpop.f32.mrf.mxu1 }
 0x174   :  { %v1904_v13 = vpop.f32.mrf.mxu3 }
 0x175   :  { %v1905_v16 = vadd.f32 %v3239_v15, %v1904_v13 }
 0x17c   :  { %v1906_v14 = vpop.f32.mrf.mxu3 }
 0x17f   :  { %v1917_v17 = vpop.f32.mrf.mxu1 }
 0x180   :  { %v1918_v18 = vadd.f32 %v1917_v17, %v1905_v16 }
 0x187   :  { %v1919_v55 = vpop.f32.mrf.mxu1 }
 0x1c0   :  { %v1930_v25 = vpop.f32.mrf.mxu2 }
 0x1c1   :  { %v1931_v57 = vadd.f32 %v1930_v25, %v1918_v18 }
 0x1c8   :  { %v1932_v51 = vpop.f32.mrf.mxu2 }
 0x1e2   :  { %v1943_v27 = vpop.f32.mrf.mxu0 }
 0x1e3   :  { %v1944_v30 = vadd.f32 %v1943_v27, %v1931_v57 }
 0x1e5   :  { %v1947_v28 = vmax.f32 %v1944_v30, 0.0 }
 0x1e7   :  { %v1948_v29 = vpack.c.bf16 %v1947_v28, %v1947_v28 }
 0x1e9   :  { %2025 = vmatmul.bf16.vlgmr.msrb.gmra.mxu3 %v1948_v29 }
 0x1ea   :  { %v1945_v31 = vpop.f32.mrf.mxu0 }
 0x26c   :  { %v2026_v35 = vpop.f32.mrf.mxu3 }
 0x26d   :  { %v2027_v33 = vadd.f32 %v3240_v32, %v2026_v35 }
 0x26f   :  { %2030 = vmax.xlane.f32.xlu0 %v2027_v33 }
 0x274   :  { %v2028_v34 = vpop.f32.mrf.mxu3 }
 0x2e2   :  { %v2031_v36 = vpop.xlane.xlu0 %2030 }
 0x2e3   :  { %v2032_v37 = vsub.f32 %v2027_v33, %v2031_v36 }
 0x2e5   :  { %v2033_v38 = vmul.f32 1.442695, %v2032_v37 }
 0x2e7   :  { %3241 = vpow2.f32 %v2033_v38 }
 0x2ed   :  { %v3242_v39 = vpop.eup %3241 }
 0x2ee   :  { %2035 = vadd.xlane.f32.xlu0 %v3242_v39 }
 0x361   :  { %v2036_v40 = vpop.xlane.xlu0 %2035 }
 0x362   :  { %3243 = vlog2.f32 %v2036_v40 }
 0x368   :  { %v3244_v41 = vpop.eup %3243 }
 0x369   :  { %v2038_v42 = vmul.f32 0.6931472, %v3244_v41 }
 0x36b   :  { %v2039_v43 = vadd.f32 %v2038_v42, %v2031_v36 }
 0x36d   :  { %v2040_v44 = vsub.f32 %v2027_v33, %v2039_v43 }
 0x36f   :  { %v2041_v45 = vpack.c.bf16 %v2040_v44, %v2040_v44 }
 0x371   :  { %2042 = vst [vmem:[%s3549_s7] sm:$0xf] %v2041_v45 }
 0x372   :  { %2047 = vsyncpa [#allocation3], 1 }
 0x373   :  { %2048 = vsyncpa [#allocation5], 1 }

</bundles_post_ra>
